<compile_context>
chip_gen: v7x
topology: tpu7x:2x2x1
jax: 0.10.0
libtpu: 0.0.40
codegen_flags: <defaults>
</compile_context>

<pallas_src>
import functools
import math

import jax
import jax.numpy as jnp
from jax.experimental import pallas as pl
from jax.experimental.pallas import tpu as pltpu

PAD_IDX = 0
LN_EPS = 1e-5

SELF_ATTN_KEYS = ("wqkv", "bqkv", "wo", "bo", "gamma", "beta")
CROSS_ATTN_KEYS = ("wq", "bq", "wkv", "bkv", "wo", "bo", "gamma", "beta")
FFN_KEYS = ("w1", "b1", "w2", "b2", "gamma", "beta")


# ---------------------------------------------------------------------------
# In-kernel building blocks (operate on arrays, called from fused kernels)
# ---------------------------------------------------------------------------
def _layer_norm(x, gamma, beta):
    mean = jnp.mean(x, axis=-1, keepdims=True)
    var = jnp.mean(jnp.square(x - mean), axis=-1, keepdims=True)
    return (x - mean) * jax.lax.rsqrt(var + LN_EPS) * gamma + beta


def _mha_addnorm(xq, q, k, v, pad, causal, q_offset, head, dk, dv,
                 wo, bo, gamma, beta):
    """LayerNorm( Wo(MultiHeadAttn) + xq ) from pre-projected q/k/v.

    xq : (tq, E)  residual (bf16 or f32);  q: (tq, H*dk) f32
    k  : (Lk, H*dk) f32;  v: (Lk, H*dv) f32;  pad: (1, Lk), 1.0 => masked key.
    """
    tq = q.shape[0]
    lk = k.shape[0]

    qh = jnp.transpose(q.reshape(tq, head, dk), (1, 0, 2)).astype(jnp.bfloat16)  # (H,tq,dk)
    kh = jnp.transpose(k.reshape(lk, head, dk), (1, 0, 2)).astype(jnp.bfloat16)  # (H,Lk,dk)
    vh = jnp.transpose(v.reshape(lk, head, dv), (1, 0, 2)).astype(jnp.bfloat16)  # (H,Lk,dv)
    # TODO(synk): fold these transposes / the back-transpose into the projections
    # (weights pre-arranged (E,H,dk), 'hqd,hde->qe' output contraction) at large dims.

    scale = 1.0 / math.sqrt(dk)
    s = jnp.einsum('hqd,hkd->hqk', qh, kh,
                   preferred_element_type=jnp.float32) * scale                  # (H,tq,Lk)

    mask = pad > 0.5                                                             # (1, Lk)
    if causal:
        rows = jax.lax.broadcasted_iota(jnp.int32, (tq, lk), 0) + q_offset
        cols = jax.lax.broadcasted_iota(jnp.int32, (tq, lk), 1)
        mask = jnp.logical_or(mask, cols > rows)                                 # (tq, Lk)
    s = jnp.where(jnp.broadcast_to(mask, s.shape), -1e9, s)

    # Softmax in f32; reciprocal on the EUP path.
    s = s - jnp.max(s, axis=-1, keepdims=True)
    p = jnp.exp(s)
    denom = jnp.sum(p, axis=-1, keepdims=True)
    p = p * pl.reciprocal(denom, approx=True)

    o = jnp.einsum('hqk,hkd->hqd', p.astype(jnp.bfloat16), vh,
                   preferred_element_type=jnp.float32)                           # (H,tq,dv)
    o = jnp.transpose(o, (1, 0, 2)).reshape(tq, head * dv)                       # (tq,H*dv)

    z = jnp.dot(o.astype(jnp.bfloat16), wo, preferred_element_type=jnp.float32) + bo
    return _layer_norm(z + xq.astype(jnp.float32), gamma, beta)


def _self_attention_addnorm(xq, x_full, pad, causal, q_offset, fuse_qkv,
                            head, dk, dv, wqkv, bqkv, wo, bo, gamma, beta):
    """Self-attention: Q from the query tile, K/V from the full sequence.
    When the tile covers the whole sequence, one fused (L,E)@(E,H*(2dk+dv)) matmul."""
    nqk = head * dk
    if fuse_qkv:
        qkv = jnp.dot(xq, wqkv, preferred_element_type=jnp.float32) + bqkv       # (L, H*(2dk+dv))
        q = qkv[:, :nqk]
        k = qkv[:, nqk:2 * nqk]
        v = qkv[:, 2 * nqk:]
    else:
        q = jnp.dot(xq, wqkv[:, :nqk],
                    preferred_element_type=jnp.float32) + bqkv[:, :nqk]
        kv = jnp.dot(x_full, wqkv[:, nqk:],
                     preferred_element_type=jnp.float32) + bqkv[:, nqk:]
        k = kv[:, :nqk]
        v = kv[:, nqk:]
    return _mha_addnorm(xq, q, k, v, pad, causal, q_offset, head, dk, dv,
                        wo, bo, gamma, beta)


def _cross_attention_addnorm(xq, xkv, pad, head, dk, dv,
                             wq, bq, wkv, bkv, wo, bo, gamma, beta):
    q = jnp.dot(xq.astype(jnp.bfloat16), wq, preferred_element_type=jnp.float32) + bq
    kv = jnp.dot(xkv.astype(jnp.bfloat16), wkv, preferred_element_type=jnp.float32) + bkv
    k = kv[:, :head * dk]
    v = kv[:, head * dk:]
    return _mha_addnorm(xq, q, k, v, pad, False, 0, head, dk, dv, wo, bo, gamma, beta)


def _ffn_addnorm(x, w1, b1, w2, b2, gamma, beta):
    h = jnp.dot(x.astype(jnp.bfloat16), w1, preferred_element_type=jnp.float32) + b1
    h = jnp.maximum(h, 0.0)
    z = jnp.dot(h.astype(jnp.bfloat16), w2, preferred_element_type=jnp.float32) + b2
    return _layer_norm(z + x, gamma, beta)
    # TODO(synk): tile f_size (k-style grid axis / emit_pipeline) for realistic f_size
    # so the fused block fits v7x's 64 MiB VMEM.


# ---------------------------------------------------------------------------
# Fused per-block Pallas kernels
# ---------------------------------------------------------------------------
def encoder_block_kernel(x_ref, xfull_ref, pad_ref,
                         wqkv_ref, bqkv_ref, wo_ref, bo_ref, ga_ref, ba_ref,
                         w1_ref, b1_ref, w2_ref, b2_ref, gf_ref, bf_ref,
                         out_ref, *, head, dk, dv, tq, fuse_qkv):
    x = x_ref[0]            # (tq, E) bf16  (query tile)
    xfull = xfull_ref[0]    # (L,  E) bf16  (K/V source)
    pad = pad_ref[0]        # (1, L)  f32
    h = _self_attention_addnorm(x, xfull, pad, False, 0, fuse_qkv, head, dk, dv,
                                wqkv_ref[...], bqkv_ref[...], wo_ref[...], bo_ref[...],
                                ga_ref[...], ba_ref[...])
    out_ref[0] = _ffn_addnorm(h, w1_ref[...], b1_ref[...], w2_ref[...], b2_ref[...],
                              gf_ref[...], bf_ref[...]).astype(out_ref.dtype)


def decoder_block_kernel(y_ref, yfull_ref, encz_ref, dpad_ref, epad_ref,
                         s_wqkv, s_bqkv, s_wo, s_bo, s_g, s_b,
                         c_wq, c_bq, c_wkv, c_bkv, c_wo, c_bo, c_g, c_b,
                         w1_ref, b1_ref, w2_ref, b2_ref, gf_ref, bf_ref,
                         out_ref, *, head, dk, dv, tq, fuse_qkv):
    y = y_ref[0]            # (tq, E) bf16
    yfull = yfull_ref[0]    # (Ld, E) bf16
    z = encz_ref[0]         # (Le, E) bf16
    dpad = dpad_ref[0]      # (1, Ld)
    epad = epad_ref[0]      # (1, Le)
    q_off = pl.program_id(1) * tq
    h1 = _self_attention_addnorm(y, yfull, dpad, True, q_off, fuse_qkv, head, dk, dv,
                                 s_wqkv[...], s_bqkv[...], s_wo[...], s_bo[...],
                                 s_g[...], s_b[...])
    h2 = _cross_attention_addnorm(h1, z, epad, head, dk, dv,
                                  c_wq[...], c_bq[...], c_wkv[...], c_bkv[...],
                                  c_wo[...], c_bo[...], c_g[...], c_b[...])
    out_ref[0] = _ffn_addnorm(h2, w1_ref[...], b1_ref[...], w2_ref[...], b2_ref[...],
                              gf_ref[...], bf_ref[...]).astype(out_ref.dtype)
    # TODO(synk): flash-style Lk-tiled attention (online-softmax scratch) for long
    # sequences instead of holding the full (H, tq, Lk) score tile.


def linear_kernel(x_ref, w_ref, b_ref, out_ref):
    x = x_ref[...].astype(jnp.bfloat16)
    out_ref[...] = (jnp.dot(x, w_ref[...], preferred_element_type=jnp.float32)
                    + b_ref[...]).astype(out_ref.dtype)


# ---------------------------------------------------------------------------
# pallas_call wrappers
# ---------------------------------------------------------------------------
def _pick_q_tile(L):
    if L <= 256:
        return L
    for t in (256, 128):
        if L % t == 0:
            return t
    return L


def _pick_tile(n, candidates):
    for t in candidates:
        if n % t == 0:
            return t
    return n


def _wspec(arr):
    nd = arr.ndim
    return pl.BlockSpec(arr.shape, lambda b, qi, _n=nd: (0,) * _n)
    # TODO(synk): pipeline_mode=pl.Buffered(1) for weights once single-buffering is
    # verified on all targets (halves weight VMEM footprint on v7x).


def encoder_block(x, pad, attn_p, ffn_p, head, dk, dv):
    B, L, E = x.shape
    tq = _pick_q_tile(L)
    nq = L // tq
    fuse_qkv = (nq == 1)
    attn_vals = [attn_p[k] for k in SELF_ATTN_KEYS]
    ffn_vals = [ffn_p[k] for k in FFN_KEYS]
    kern = functools.partial(encoder_block_kernel, head=head, dk=dk, dv=dv,
                             tq=tq, fuse_qkv=fuse_qkv)
    return pl.pallas_call(
        kern,
        out_shape=jax.ShapeDtypeStruct((B, L, E), jnp.bfloat16),
        grid=(B, nq),
        in_specs=[
            pl.BlockSpec((1, tq, E), lambda b, qi: (b, qi, 0)),   # query tile
            pl.BlockSpec((1, L, E), lambda b, qi: (b, 0, 0)),     # full seq for K/V
            pl.BlockSpec((1, 1, L), lambda b, qi: (b, 0, 0)),     # key pad vector
        ] + [_wspec(a) for a in attn_vals + ffn_vals],
        out_specs=pl.BlockSpec((1, tq, E), lambda b, qi: (b, qi, 0)),
        compiler_params=pltpu.CompilerParams(
            dimension_semantics=("parallel", "parallel")),
    )(x, x, pad, *attn_vals, *ffn_vals)


def decoder_block(y, enc_z, dpad, epad, sa_p, ca_p, ffn_p, head, dk, dv):
    B, Ld, E = y.shape
    Le = enc_z.shape[1]
    tq = _pick_q_tile(Ld)
    nq = Ld // tq
    fuse_qkv = (nq == 1)
    sa_vals = [sa_p[k] for k in SELF_ATTN_KEYS]
    ca_vals = [ca_p[k] for k in CROSS_ATTN_KEYS]
    ffn_vals = [ffn_p[k] for k in FFN_KEYS]
    kern = functools.partial(decoder_block_kernel, head=head, dk=dk, dv=dv,
                             tq=tq, fuse_qkv=fuse_qkv)
    return pl.pallas_call(
        kern,
        out_shape=jax.ShapeDtypeStruct((B, Ld, E), jnp.bfloat16),
        grid=(B, nq),
        in_specs=[
            pl.BlockSpec((1, tq, E), lambda b, qi: (b, qi, 0)),   # query tile
            pl.BlockSpec((1, Ld, E), lambda b, qi: (b, 0, 0)),    # full dec seq (K/V)
            pl.BlockSpec((1, Le, E), lambda b, qi: (b, 0, 0)),    # encoder output (K/V)
            pl.BlockSpec((1, 1, Ld), lambda b, qi: (b, 0, 0)),    # dec pad vector
            pl.BlockSpec((1, 1, Le), lambda b, qi: (b, 0, 0)),    # enc pad vector
        ] + [_wspec(a) for a in sa_vals + ca_vals + ffn_vals],
        out_specs=pl.BlockSpec((1, tq, E), lambda b, qi: (b, qi, 0)),
        compiler_params=pltpu.CompilerParams(
            dimension_semantics=("parallel", "parallel")),
    )(y, y, enc_z, dpad, epad, *sa_vals, *ca_vals, *ffn_vals)


def final_linear(x, w, b, vocab):
    """x: (B, L, E) bf16; w: (E, Vp) bf16 (Vp lane-multiple); b: (1, Vp) f32."""
    B, L, E = x.shape
    BL = B * L
    Vp = w.shape[1]
    x2 = x.reshape(BL, E)                     # flatten batch*seq -> dense sublanes
    tm = _pick_tile(BL, (512, 256, 128))
    tn = _pick_tile(Vp, (512, 256, 128))
    out = pl.pallas_call(
        linear_kernel,
        out_shape=jax.ShapeDtypeStruct((BL, Vp), jnp.float32),
        grid=(BL // tm, Vp // tn),
        in_specs=[
            pl.BlockSpec((tm, E), lambda i, j: (i, 0)),
            pl.BlockSpec((E, tn), lambda i, j: (0, j)),
            pl.BlockSpec((1, tn), lambda i, j: (0, j)),
        ],
        out_specs=pl.BlockSpec((tm, tn), lambda i, j: (i, j)),
        compiler_params=pltpu.CompilerParams(
            dimension_semantics=("parallel", "parallel")),
    )(x2, w, b)
    return out[:, :vocab].reshape(B, L, vocab)


# ---------------------------------------------------------------------------
# Parameter init (deterministic, synthetic) and plain-JAX glue
# ---------------------------------------------------------------------------
def sinusoidal_pos_encoding(max_len, emb_size):
    pos = jnp.arange(max_len, dtype=jnp.float32)[:, None]
    div = jnp.exp(-jnp.arange(0, emb_size, 2, dtype=jnp.float32)
                  * (math.log(10000.0) / emb_size))
    fill = pos * div
    pe = jnp.stack([jnp.sin(fill), jnp.cos(fill)], axis=-1)
    return pe.reshape(max_len, emb_size)


def init_linear(key, fan_in, fan_out):
    kw, kb = jax.random.split(key)
    w = jax.random.normal(kw, (fan_in, fan_out), jnp.float32) / math.sqrt(fan_in)
    b = jax.random.normal(kb, (1, fan_out), jnp.float32) * 0.01
    return w, b


def init_self_attn(key, emb, dk, dv, head):
    ks = jax.random.split(key, 4)
    wq, bq = init_linear(ks[0], emb, head * dk)
    wk, bk = init_linear(ks[1], emb, head * dk)
    wv, bv = init_linear(ks[2], emb, head * dv)
    wo, bo = init_linear(ks[3], head * dv, emb)
    return dict(
        wqkv=jnp.concatenate([wq, wk, wv], axis=1).astype(jnp.bfloat16),  # fused Q|K|V
        bqkv=jnp.concatenate([bq, bk, bv], axis=1),
        wo=wo.astype(jnp.bfloat16), bo=bo,
        gamma=jnp.ones((1, emb), jnp.float32),
        beta=jnp.zeros((1, emb), jnp.float32))


def init_cross_attn(key, emb, dk, dv, head):
    ks = jax.random.split(key, 4)
    wq, bq = init_linear(ks[0], emb, head * dk)
    wk, bk = init_linear(ks[1], emb, head * dk)
    wv, bv = init_linear(ks[2], emb, head * dv)
    wo, bo = init_linear(ks[3], head * dv, emb)
    return dict(
        wq=wq.astype(jnp.bfloat16), bq=bq,
        wkv=jnp.concatenate([wk, wv], axis=1).astype(jnp.bfloat16),       # fused K|V
        bkv=jnp.concatenate([bk, bv], axis=1),
        wo=wo.astype(jnp.bfloat16), bo=bo,
        gamma=jnp.ones((1, emb), jnp.float32),
        beta=jnp.zeros((1, emb), jnp.float32))


def init_ffn(key, emb, f_size):
    k1, k2 = jax.random.split(key)
    w1, b1 = init_linear(k1, emb, f_size)
    w2, b2 = init_linear(k2, f_size, emb)
    return dict(w1=w1.astype(jnp.bfloat16), b1=b1,
                w2=w2.astype(jnp.bfloat16), b2=b2,
                gamma=jnp.ones((1, emb), jnp.float32),
                beta=jnp.zeros((1, emb), jnp.float32))


def _round_up(n, m):
    return ((n + m - 1) // m) * m


def init_transformer(key, enc_vocab, dec_vocab, emb, dk, dv, f_size, head, nblocks,
                     max_len=512):
    keys = jax.random.split(key, 4 + 5 * nblocks)
    i = 0
    params = {}
    params["enc_emb"] = jax.random.normal(keys[i], (enc_vocab, emb), jnp.float32); i += 1
    params["dec_emb"] = jax.random.normal(keys[i], (dec_vocab, emb), jnp.float32); i += 1
    params["pos_enc"] = sinusoidal_pos_encoding(max_len, emb)
    params["enc_blocks"] = []
    for _ in range(nblocks):
        params["enc_blocks"].append(dict(
            attn=init_self_attn(keys[i], emb, dk, dv, head),
            ffn=init_ffn(keys[i + 1], emb, f_size)))
        i += 2
    params["dec_blocks"] = []
    for _ in range(nblocks):
        params["dec_blocks"].append(dict(
            self_attn=init_self_attn(keys[i], emb, dk, dv, head),
            cross_attn=init_cross_attn(keys[i + 1], emb, dk, dv, head),
            ffn=init_ffn(keys[i + 2], emb, f_size)))
        i += 3
    ow, ob = init_linear(keys[i], emb, dec_vocab)
    vp = _round_up(dec_vocab, 128)                      # lane-dense padded vocab
    params["out_w"] = jnp.pad(ow, ((0, 0), (0, vp - dec_vocab))).astype(jnp.bfloat16)
    params["out_b"] = jnp.pad(ob, ((0, 0), (0, vp - dec_vocab)))
    return params


def embed(table, ids, pos_enc):
    x = jnp.take(table, ids, axis=0)                    # (B, L, E)
    return x + pos_enc[None, :ids.shape[1], :]
    # TODO(synk): dropout after embedding is eval-mode identity here.


def transformer_forward(params, enc_x, dec_x, head, dk, dv, dec_vocab):
    # Only (B, 1, L) pad vectors leave the wrapper; full masks are built in-kernel.
    enc_pad = (enc_x == PAD_IDX).astype(jnp.float32)[:, None, :]    # (B, 1, Le)
    dec_pad = (dec_x == PAD_IDX).astype(jnp.float32)[:, None, :]    # (B, 1, Ld)

    # ----- Encoder ----- (bf16 activations between layers)
    x = embed(params["enc_emb"], enc_x, params["pos_enc"]).astype(jnp.bfloat16)
    for blk in params["enc_blocks"]:
        x = encoder_block(x, enc_pad, blk["attn"], blk["ffn"], head, dk, dv)
    enc_z = x

    # ----- Decoder -----
    y = embed(params["dec_emb"], dec_x, params["pos_enc"]).astype(jnp.bfloat16)
    for blk in params["dec_blocks"]:
        y = decoder_block(y, enc_z, dec_pad, enc_pad,
                          blk["self_attn"], blk["cross_attn"], blk["ffn"],
                          head, dk, dv)

    return final_linear(y, params["out_w"], params["out_b"], dec_vocab)


# ---------------------------------------------------------------------------
if __name__ == "__main__":
    # small config
    enc_vocab_size, dec_vocab_size = 50, 60
    emb_size, q_k_size, v_size, f_size = 32, 8, 8, 64
    head, nblocks = 2, 2
    B, Le, Ld = 2, 8, 8

    key = jax.random.PRNGKey(0)
    kp, ke, kd = jax.random.split(key, 3)
    params = init_transformer(kp, enc_vocab_size, dec_vocab_size,
                              emb_size, q_k_size, v_size, f_size, head, nblocks)

    enc_x = jax.random.randint(ke, (B, Le), 0, enc_vocab_size, dtype=jnp.int32)
    dec_x = jax.random.randint(kd, (B, Ld), 0, dec_vocab_size, dtype=jnp.int32)
    # put a couple of PAD tokens in to exercise the padding masks
    enc_x = enc_x.at[:, -1].set(PAD_IDX)
    dec_x = dec_x.at[:, -1].set(PAD_IDX)

    fwd = jax.jit(functools.partial(transformer_forward,
                                    head=head, dk=q_k_size, dv=v_size,
                                    dec_vocab=dec_vocab_size))
    out = fwd(params, enc_x, dec_x)
    out = jax.block_until_ready(out)
    assert out.shape == (B, Ld, dec_vocab_size)
    assert bool(jnp.all(jnp.isfinite(out)))
    print("KERNEL_OK")
</pallas_src>

<mosaic_0001>
module attributes {stable_mosaic.version = 11 : i64} {
  func.func @linear_kernel(%arg0: i32, %arg1: i32, %arg2: memref<16x32xbf16, #tpu.memory_space<vmem>>, %arg3: memref<32x128xbf16, #tpu.memory_space<vmem>>, %arg4: memref<1x128xf32, #tpu.memory_space<vmem>>, %arg5: memref<16x128xf32, #tpu.memory_space<vmem>>) attributes {dimension_semantics = [#tpu.dimension_semantics<parallel>, #tpu.dimension_semantics<parallel>], iteration_bounds = array<i64: 1, 1>, scalar_prefetch = 0 : i64, scratch_operands = 0 : i64, tpu.core_type = #tpu.core_type<tc>, window_params = [{transform_indices = @transform_0, window_bounds = array<i64: 16, 32>}, {transform_indices = @transform_1, window_bounds = array<i64: 32, 128>}, {transform_indices = @transform_2, window_bounds = array<i64: 1, 128>}, {transform_indices = @transform_3, window_bounds = array<i64: 16, 128>}]} {
    %c0 = arith.constant 0 : index
    %c0_0 = arith.constant 0 : index
    %0 = vector.load %arg2[%c0, %c0_0] : memref<16x32xbf16, #tpu.memory_space<vmem>>, vector<16x32xbf16>
    %c0_1 = arith.constant 0 : index
    %c0_2 = arith.constant 0 : index
    %1 = vector.load %arg3[%c0_1, %c0_2] : memref<32x128xbf16, #tpu.memory_space<vmem>>, vector<32x128xbf16>
    %cst = arith.constant dense<0.000000e+00> : vector<16x128xf32>
    %2 = tpu.matmul %0, %1, %cst {dimension_numbers = #tpu.dot_dimension_numbers<[1], [0], [0], [1], [0, 0, 1, 1], [], []>} : vector<16x32xbf16>, vector<32x128xbf16>, vector<16x128xf32> -> vector<16x128xf32>
    %c0_3 = arith.constant 0 : index
    %c0_4 = arith.constant 0 : index
    %3 = vector.load %arg4[%c0_3, %c0_4] : memref<1x128xf32, #tpu.memory_space<vmem>>, vector<1x128xf32>
    %4 = vector.broadcast %3 : vector<1x128xf32> to vector<16x128xf32>
    %5 = arith.addf %2, %4 : vector<16x128xf32>
    %c0_5 = arith.constant 0 : index
    %c0_6 = arith.constant 0 : index
    %6 = vector.load %arg5[%c0_5, %c0_6] : memref<16x128xf32, #tpu.memory_space<vmem>>, vector<16x128xf32>
    tpu.vector_store %arg5[%c0_5, %c0_6], %5 {strides = array<i32>} : memref<16x128xf32, #tpu.memory_space<vmem>>, vector<16x128xf32>,
    return
  }
  func.func @transform_0(%arg0: i32, %arg1: i32) -> (i32, i32) {
    %c0_i32 = arith.constant 0 : i32
    %c0_i32_0 = arith.constant 0 : i32
    return %arg0, %c0_i32 : i32, i32
  }
  func.func @transform_1(%arg0: i32, %arg1: i32) -> (i32, i32) {
    %c0_i32 = arith.constant 0 : i32
    %c0_i32_0 = arith.constant 0 : i32
    return %c0_i32, %arg1 : i32, i32
  }
  func.func @transform_2(%arg0: i32, %arg1: i32) -> (i32, i32) {
    %c0_i32 = arith.constant 0 : i32
    %c0_i32_0 = arith.constant 0 : i32
    return %c0_i32, %arg1 : i32, i32
  }
  func.func @transform_3(%arg0: i32, %arg1: i32) -> (i32, i32) {
    %c0_i32 = arith.constant 0 : i32
    return %arg0, %arg1 : i32, i32
  }
}

module attributes {stable_mosaic.version = 11 : i64} {
  func.func @encoder_block_kernel(%arg0: i32, %arg1: i32, %arg2: memref<1x8x32xbf16, #tpu.memory_space<vmem>>, %arg3: memref<1x8x32xbf16, #tpu.memory_space<vmem>>, %arg4: memref<1x1x8xf32, #tpu.memory_space<vmem>>, %arg5: memref<32x48xbf16, #tpu.memory_space<vmem>>, %arg6: memref<1x48xf32, #tpu.memory_space<vmem>>, %arg7: memref<16x32xbf16, #tpu.memory_space<vmem>>, %arg8: memref<1x32xf32, #tpu.memory_space<vmem>>, %arg9: memref<1x32xf32, #tpu.memory_space<vmem>>, %arg10: memref<1x32xf32, #tpu.memory_space<vmem>>, %arg11: memref<32x64xbf16, #tpu.memory_space<vmem>>, %arg12: memref<1x64xf32, #tpu.memory_space<vmem>>, %arg13: memref<64x32xbf16, #tpu.memory_space<vmem>>, %arg14: memref<1x32xf32, #tpu.memory_space<vmem>>, %arg15: memref<1x32xf32, #tpu.memory_space<vmem>>, %arg16: memref<1x32xf32, #tpu.memory_space<vmem>>, %arg17: memref<1x8x32xbf16, #tpu.memory_space<vmem>>) attributes {dimension_semantics = [#tpu.dimension_semantics<parallel>, #tpu.dimension_semantics<parallel>], iteration_bounds = array<i64: 2, 1>, scalar_prefetch = 0 : i64, scratch_operands = 0 : i64, tpu.core_type = #tpu.core_type<tc>, window_params = [{transform_indices = @transform_0, window_bounds = array<i64: 1, 8, 32>}, {transform_indices = @transform_1, window_bounds = array<i64: 1, 8, 32>}, {transform_indices = @transform_2, window_bounds = array<i64: 1, 1, 8>}, {pipeline_mode = #tpu.pipeline_mode<synchronous>, transform_indices = @transform_3, window_bounds = array<i64: 32, 48>}, {pipeline_mode = #tpu.pipeline_mode<synchronous>, transform_indices = @transform_4, window_bounds = array<i64: 1, 48>}, {pipeline_mode = #tpu.pipeline_mode<synchronous>, transform_indices = @transform_5, window_bounds = array<i64: 16, 32>}, {pipeline_mode = #tpu.pipeline_mode<synchronous>, transform_indices = @transform_6, window_bounds = array<i64: 1, 32>}, {pipeline_mode = #tpu.pipeline_mode<synchronous>, transform_indices = @transform_7, window_bounds = array<i64: 1, 32>}, {pipeline_mode = #tpu.pipeline_mode<synchronous>, transform_indices = @transform_8, window_bounds = array<i64: 1, 32>}, {pipeline_mode = #tpu.pipeline_mode<synchronous>, transform_indices = @transform_9, window_bounds = array<i64: 32, 64>}, {pipeline_mode = #tpu.pipeline_mode<synchronous>, transform_indices = @transform_10, window_bounds = array<i64: 1, 64>}, {pipeline_mode = #tpu.pipeline_mode<synchronous>, transform_indices = @transform_11, window_bounds = array<i64: 64, 32>}, {pipeline_mode = #tpu.pipeline_mode<synchronous>, transform_indices = @transform_12, window_bounds = array<i64: 1, 32>}, {pipeline_mode = #tpu.pipeline_mode<synchronous>, transform_indices = @transform_13, window_bounds = array<i64: 1, 32>}, {pipeline_mode = #tpu.pipeline_mode<synchronous>, transform_indices = @transform_14, window_bounds = array<i64: 1, 32>}, {transform_indices = @transform_15, window_bounds = array<i64: 1, 8, 32>}]} {
    %c0 = arith.constant 0 : index
    %c0_0 = arith.constant 0 : index
    %c0_1 = arith.constant 0 : index
    %0 = vector.load %arg2[%c0, %c0_0, %c0_1] : memref<1x8x32xbf16, #tpu.memory_space<vmem>>, vector<1x8x32xbf16>
    %1 = vector.shape_cast %0 : vector<1x8x32xbf16> to vector<8x32xbf16>
    %c0_2 = arith.constant 0 : index
    %c0_3 = arith.constant 0 : index
    %c0_4 = arith.constant 0 : index
    %2 = vector.load %arg4[%c0_2, %c0_3, %c0_4] : memref<1x1x8xf32, #tpu.memory_space<vmem>>, vector<1x1x8xf32>
    %3 = vector.shape_cast %2 : vector<1x1x8xf32> to vector<1x8xf32>
    %c0_5 = arith.constant 0 : index
    %c0_6 = arith.constant 0 : index
    %4 = vector.load %arg5[%c0_5, %c0_6] : memref<32x48xbf16, #tpu.memory_space<vmem>>, vector<32x48xbf16>
    %c0_7 = arith.constant 0 : index
    %c0_8 = arith.constant 0 : index
    %5 = vector.load %arg6[%c0_7, %c0_8] : memref<1x48xf32, #tpu.memory_space<vmem>>, vector<1x48xf32>
    %c0_9 = arith.constant 0 : index
    %c0_10 = arith.constant 0 : index
    %6 = vector.load %arg7[%c0_9, %c0_10] : memref<16x32xbf16, #tpu.memory_space<vmem>>, vector<16x32xbf16>
    %c0_11 = arith.constant 0 : index
    %c0_12 = arith.constant 0 : index
    %7 = vector.load %arg8[%c0_11, %c0_12] : memref<1x32xf32, #tpu.memory_space<vmem>>, vector<1x32xf32>
    %c0_13 = arith.constant 0 : index
    %c0_14 = arith.constant 0 : index
    %8 = vector.load %arg9[%c0_13, %c0_14] : memref<1x32xf32, #tpu.memory_space<vmem>>, vector<1x32xf32>
    %c0_15 = arith.constant 0 : index
    %c0_16 = arith.constant 0 : index
    %9 = vector.load %arg10[%c0_15, %c0_16] : memref<1x32xf32, #tpu.memory_space<vmem>>, vector<1x32xf32>
    %cst = arith.constant dense<0.000000e+00> : vector<8x48xf32>
    %10 = tpu.matmul %1, %4, %cst {dimension_numbers = #tpu.dot_dimension_numbers<[1], [0], [0], [1], [0, 0, 1, 1], [], []>} : vector<8x32xbf16>, vector<32x48xbf16>, vector<8x48xf32> -> vector<8x48xf32>
    %11 = vector.broadcast %5 : vector<1x48xf32> to vector<8x48xf32>
    %12 = arith.addf %10, %11 : vector<8x48xf32>
    %13 = vector.extract_strided_slice %12 {offsets = [0, 0], sizes = [8, 16], strides = [1, 1]} : vector<8x48xf32> to vector<8x16xf32>
    %14 = vector.extract_strided_slice %12 {offsets = [0, 16], sizes = [8, 16], strides = [1, 1]} : vector<8x48xf32> to vector<8x16xf32>
    %15 = vector.extract_strided_slice %12 {offsets = [0, 32], sizes = [8, 16], strides = [1, 1]} : vector<8x48xf32> to vector<8x16xf32>
    %16 = vector.shape_cast %13 : vector<8x16xf32> to vector<8x2x8xf32>
    %17 = tpu.transpose %16, [1, 0, 2] : vector<8x2x8xf32> -> vector<2x8x8xf32>
    %18 = arith.truncf %17 : vector<2x8x8xf32> to vector<2x8x8xbf16>
    %19 = vector.shape_cast %14 : vector<8x16xf32> to vector<8x2x8xf32>
    %20 = tpu.transpose %19, [1, 0, 2] : vector<8x2x8xf32> -> vector<2x8x8xf32>
    %21 = arith.truncf %20 : vector<2x8x8xf32> to vector<2x8x8xbf16>
    %22 = vector.shape_cast %15 : vector<8x16xf32> to vector<8x2x8xf32>
    %23 = tpu.transpose %22, [1, 0, 2] : vector<8x2x8xf32> -> vector<2x8x8xf32>
    %24 = arith.truncf %23 : vector<2x8x8xf32> to vector<2x8x8xbf16>
    "tpu.trace_start"() <{level = 10 : i32, message = "hqd,hkd->hqk"}> : () -> ()
    %cst_17 = arith.constant dense<0.000000e+00> : vector<2x8x8xf32>
    %25 = tpu.matmul %18, %21, %cst_17 {dimension_numbers = #tpu.dot_dimension_numbers<[2], [2], [1], [1], [0, 0, 0, 1, 1, 1], [0], [0]>} : vector<2x8x8xbf16>, vector<2x8x8xbf16>, vector<2x8x8xf32> -> vector<2x8x8xf32>
    "tpu.trace_stop"() : () -> ()
    %cst_18 = arith.constant 0.353553385 : f32
    %26 = vector.broadcast %cst_18 : f32 to vector<2x8x8xf32>
    %27 = arith.mulf %25, %26 : vector<2x8x8xf32>
    %cst_19 = arith.constant 5.000000e-01 : f32
    %28 = vector.broadcast %cst_19 : f32 to vector<1x8xf32>
    %29 = arith.cmpf ogt, %3, %28 : vector<1x8xf32>
    %30 = vector.shape_cast %29 : vector<1x8xi1> to vector<1x1x8xi1>
    %31 = vector.broadcast %30 : vector<1x1x8xi1> to vector<2x8x8xi1>
    %cst_20 = arith.constant -1.000000e+09 : f32
    %32 = vector.broadcast %cst_20 : f32 to vector<2x8x8xf32>
    %33 = arith.select %31, %32, %27 : vector<2x8x8xi1>, vector<2x8x8xf32>
    %cst_21 = arith.constant dense<0xFF800000> : vector<2x8xf32>
    %34 = vector.multi_reduction <maximumf>, %33, %cst_21 [2] : vector<2x8x8xf32> to vector<2x8xf32>
    %35 = vector.shape_cast %34 : vector<2x8xf32> to vector<2x8x1xf32>
    %36 = vector.broadcast %35 : vector<2x8x1xf32> to vector<2x8x8xf32>
    %37 = arith.subf %33, %36 : vector<2x8x8xf32>
    %38 = math.exp %37 : vector<2x8x8xf32>
    %cst_22 = arith.constant dense<0.000000e+00> : vector<2x8xf32>
    %39 = vector.multi_reduction <add>, %38, %cst_22 [2] : vector<2x8x8xf32> to vector<2x8xf32>
    %40 = vector.shape_cast %39 : vector<2x8xf32> to vector<2x8x1xf32>
    %41 = tpu.reciprocal %40 {approx = true} : vector<2x8x1xf32> -> vector<2x8x1xf32>
    %42 = vector.broadcast %41 : vector<2x8x1xf32> to vector<2x8x8xf32>
    %43 = arith.mulf %38, %42 : vector<2x8x8xf32>
    %44 = arith.truncf %43 : vector<2x8x8xf32> to vector<2x8x8xbf16>
    "tpu.trace_start"() <{level = 10 : i32, message = "hqk,hkd->hqd"}> : () -> ()
    %cst_23 = arith.constant dense<0.000000e+00> : vector<2x8x8xf32>
    %45 = tpu.matmul %44, %24, %cst_23 {dimension_numbers = #tpu.dot_dimension_numbers<[2], [1], [1], [2], [0, 0, 0, 1, 1, 2], [0], [0]>} : vector<2x8x8xbf16>, vector<2x8x8xbf16>, vector<2x8x8xf32> -> vector<2x8x8xf32>
    "tpu.trace_stop"() : () -> ()
    %46 = tpu.transpose %45, [1, 0, 2] : vector<2x8x8xf32> -> vector<8x2x8xf32>
    %47 = vector.shape_cast %46 : vector<8x2x8xf32> to vector<8x16xf32>
    %48 = arith.truncf %47 : vector<8x16xf32> to vector<8x16xbf16>
    %cst_24 = arith.constant dense<0.000000e+00> : vector<8x32xf32>
    %49 = tpu.matmul %48, %6, %cst_24 {dimension_numbers = #tpu.dot_dimension_numbers<[1], [0], [0], [1], [0, 0, 1, 1], [], []>} : vector<8x16xbf16>, vector<16x32xbf16>, vector<8x32xf32> -> vector<8x32xf32>
    %50 = vector.broadcast %7 : vector<1x32xf32> to vector<8x32xf32>
    %51 = arith.addf %49, %50 : vector<8x32xf32>
    %52 = arith.extf %1 : vector<8x32xbf16> to vector<8x32xf32>
    %53 = arith.addf %51, %52 : vector<8x32xf32>
    %cst_25 = arith.constant dense<0.000000e+00> : vector<8xf32>
    %54 = vector.multi_reduction <add>, %53, %cst_25 [1] : vector<8x32xf32> to vector<8xf32>
    %55 = vector.shape_cast %54 : vector<8xf32> to vector<8x1xf32>
    %cst_26 = arith.constant 3.200000e+01 : f32
    %56 = vector.broadcast %cst_26 : f32 to vector<8x1xf32>
    %57 = arith.divf %55, %56 : vector<8x1xf32>
    %58 = vector.broadcast %57 : vector<8x1xf32> to vector<8x32xf32>
    %59 = arith.subf %53, %58 : vector<8x32xf32>
    %60 = arith.mulf %59, %59 : vector<8x32xf32>
    %cst_27 = arith.constant dense<0.000000e+00> : vector<8xf32>
    %61 = vector.multi_reduction <add>, %60, %cst_27 [1] : vector<8x32xf32> to vector<8xf32>
    %62 = vector.shape_cast %61 : vector<8xf32> to vector<8x1xf32>
    %cst_28 = arith.constant 3.200000e+01 : f32
    %63 = vector.broadcast %cst_28 : f32 to vector<8x1xf32>
    %64 = arith.divf %62, %63 : vector<8x1xf32>
    %65 = vector.broadcast %57 : vector<8x1xf32> to vector<8x32xf32>
    %66 = arith.subf %53, %65 : vector<8x32xf32>
    %cst_29 = arith.constant 9.99999974E-6 : f32
    %67 = vector.broadcast %cst_29 : f32 to vector<8x1xf32>
    %68 = arith.addf %64, %67 : vector<8x1xf32>
    %69 = math.rsqrt %68 : vector<8x1xf32>
    %70 = vector.broadcast %69 : vector<8x1xf32> to vector<8x32xf32>
    %71 = arith.mulf %66, %70 : vector<8x32xf32>
    %72 = vector.broadcast %8 : vector<1x32xf32> to vector<8x32xf32>
    %73 = arith.mulf %71, %72 : vector<8x32xf32>
    %74 = vector.broadcast %9 : vector<1x32xf32> to vector<8x32xf32>
    %75 = arith.addf %73, %74 : vector<8x32xf32>
    %c0_30 = arith.constant 0 : index
    %c0_31 = arith.constant 0 : index
    %76 = vector.load %arg11[%c0_30, %c0_31] : memref<32x64xbf16, #tpu.memory_space<vmem>>, vector<32x64xbf16>
    %c0_32 = arith.constant 0 : index
    %c0_33 = arith.constant 0 : index
    %77 = vector.load %arg12[%c0_32, %c0_33] : memref<1x64xf32, #tpu.memory_space<vmem>>, vector<1x64xf32>
    %c0_34 = arith.constant 0 : index
    %c0_35 = arith.constant 0 : index
    %78 = vector.load %arg13[%c0_34, %c0_35] : memref<64x32xbf16, #tpu.memory_space<vmem>>, vector<64x32xbf16>
    %c0_36 = arith.constant 0 : index
    %c0_37 = arith.constant 0 : index
    %79 = vector.load %arg14[%c0_36, %c0_37] : memref<1x32xf32, #tpu.memory_space<vmem>>, vector<1x32xf32>
    %c0_38 = arith.constant 0 : index
    %c0_39 = arith.constant 0 : index
    %80 = vector.load %arg15[%c0_38, %c0_39] : memref<1x32xf32, #tpu.memory_space<vmem>>, vector<1x32xf32>
    %c0_40 = arith.constant 0 : index
    %c0_41 = arith.constant 0 : index
    %81 = vector.load %arg16[%c0_40, %c0_41] : memref<1x32xf32, #tpu.memory_space<vmem>>, vector<1x32xf32>
    %82 = arith.truncf %75 : vector<8x32xf32> to vector<8x32xbf16>
    %cst_42 = arith.constant dense<0.000000e+00> : vector<8x64xf32>
    %83 = tpu.matmul %82, %76, %cst_42 {dimension_numbers = #tpu.dot_dimension_numbers<[1], [0], [0], [1], [0, 0, 1, 1], [], []>} : vector<8x32xbf16>, vector<32x64xbf16>, vector<8x64xf32> -> vector<8x64xf32>
    %84 = vector.broadcast %77 : vector<1x64xf32> to vector<8x64xf32>
    %85 = arith.addf %83, %84 : vector<8x64xf32>
    %cst_43 = arith.constant 0.000000e+00 : f32
    %86 = vector.broadcast %cst_43 : f32 to vector<8x64xf32>
    %87 = arith.maximumf %85, %86 : vector<8x64xf32>
    %88 = arith.truncf %87 : vector<8x64xf32> to vector<8x64xbf16>
    %cst_44 = arith.constant dense<0.000000e+00> : vector<8x32xf32>
    %89 = tpu.matmul %88, %78, %cst_44 {dimension_numbers = #tpu.dot_dimension_numbers<[1], [0], [0], [1], [0, 0, 1, 1], [], []>} : vector<8x64xbf16>, vector<64x32xbf16>, vector<8x32xf32> -> vector<8x32xf32>
    %90 = vector.broadcast %79 : vector<1x32xf32> to vector<8x32xf32>
    %91 = arith.addf %89, %90 : vector<8x32xf32>
    %92 = arith.addf %91, %75 : vector<8x32xf32>
    %cst_45 = arith.constant dense<0.000000e+00> : vector<8xf32>
    %93 = vector.multi_reduction <add>, %92, %cst_45 [1] : vector<8x32xf32> to vector<8xf32>
    %94 = vector.shape_cast %93 : vector<8xf32> to vector<8x1xf32>
    %cst_46 = arith.constant 3.200000e+01 : f32
    %95 = vector.broadcast %cst_46 : f32 to vector<8x1xf32>
    %96 = arith.divf %94, %95 : vector<8x1xf32>
    %97 = vector.broadcast %96 : vector<8x1xf32> to vector<8x32xf32>
    %98 = arith.subf %92, %97 : vector<8x32xf32>
    %99 = arith.mulf %98, %98 : vector<8x32xf32>
    %cst_47 = arith.constant dense<0.000000e+00> : vector<8xf32>
    %100 = vector.multi_reduction <add>, %99, %cst_47 [1] : vector<8x32xf32> to vector<8xf32>
    %101 = vector.shape_cast %100 : vector<8xf32> to vector<8x1xf32>
    %cst_48 = arith.constant 3.200000e+01 : f32
    %102 = vector.broadcast %cst_48 : f32 to vector<8x1xf32>
    %103 = arith.divf %101, %102 : vector<8x1xf32>
    %104 = vector.broadcast %96 : vector<8x1xf32> to vector<8x32xf32>
    %105 = arith.subf %92, %104 : vector<8x32xf32>
    %cst_49 = arith.constant 9.99999974E-6 : f32
    %106 = vector.broadcast %cst_49 : f32 to vector<8x1xf32>
    %107 = arith.addf %103, %106 : vector<8x1xf32>
    %108 = math.rsqrt %107 : vector<8x1xf32>
    %109 = vector.broadcast %108 : vector<8x1xf32> to vector<8x32xf32>
    %110 = arith.mulf %105, %109 : vector<8x32xf32>
    %111 = vector.broadcast %80 : vector<1x32xf32> to vector<8x32xf32>
    %112 = arith.mulf %110, %111 : vector<8x32xf32>
    %113 = vector.broadcast %81 : vector<1x32xf32> to vector<8x32xf32>
    %114 = arith.addf %112, %113 : vector<8x32xf32>
    %115 = arith.truncf %114 : vector<8x32xf32> to vector<8x32xbf16>
    %c0_50 = arith.constant 0 : index
    %c0_51 = arith.constant 0 : index
    %c0_52 = arith.constant 0 : index
    %116 = vector.load %arg17[%c0_50, %c0_51, %c0_52] : memref<1x8x32xbf16, #tpu.memory_space<vmem>>, vector<1x8x32xbf16>
    %117 = vector.shape_cast %116 : vector<1x8x32xbf16> to vector<8x32xbf16>
    %118 = vector.shape_cast %115 : vector<8x32xbf16> to vector<1x8x32xbf16>
    tpu.vector_store %arg17[%c0_50, %c0_51, %c0_52], %118 {strides = array<i32>} : memref<1x8x32xbf16, #tpu.memory_space<vmem>>, vector<1x8x32xbf16>,
    return
  }
  func.func @transform_0(%arg0: i32, %arg1: i32) -> (i32, i32, i32) {
    %c0_i32 = arith.constant 0 : i32
    %c0_i32_0 = arith.constant 0 : i32
    return %arg0, %arg1, %c0_i32 : i32, i32, i32
  }
  func.func @transform_1(%arg0: i32, %arg1: i32) -> (i32, i32, i32) {
    %c0_i32 = arith.constant 0 : i32
    %c0_i32_0 = arith.constant 0 : i32
    %c0_i32_1 = arith.constant 0 : i32
    return %arg0, %c0_i32, %c0_i32_0 : i32, i32, i32
  }
  func.func @transform_2(%arg0: i32, %arg1: i32) -> (i32, i32, i32) {
    %c0_i32 = arith.constant 0 : i32
    %c0_i32_0 = arith.constant 0 : i32
    %c0_i32_1 = arith.constant 0 : i32
    return %arg0, %c0_i32, %c0_i32_0 : i32, i32, i32
  }
  func.func @transform_3(%arg0: i32, %arg1: i32) -> (i32, i32) {
    %c0_i32 = arith.constant 0 : i32
    %c0_i32_0 = arith.constant 0 : i32
    %c0_i32_1 = arith.constant 0 : i32
    return %c0_i32, %c0_i32_0 : i32, i32
  }
  func.func @transform_4(%arg0: i32, %arg1: i32) -> (i32, i32) {
    %c0_i32 = arith.constant 0 : i32
    %c0_i32_0 = arith.constant 0 : i32
    %c0_i32_1 = arith.constant 0 : i32
    return %c0_i32, %c0_i32_0 : i32, i32
  }
  func.func @transform_5(%arg0: i32, %arg1: i32) -> (i32, i32) {
    %c0_i32 = arith.constant 0 : i32
    %c0_i32_0 = arith.constant 0 : i32
    %c0_i32_1 = arith.constant 0 : i32
    return %c0_i32, %c0_i32_0 : i32, i32
  }
  func.func @transform_6(%arg0: i32, %arg1: i32) -> (i32, i32) {
    %c0_i32 = arith.constant 0 : i32
    %c0_i32_0 = arith.constant 0 : i32
    %c0_i32_1 = arith.constant 0 : i32
    return %c0_i32, %c0_i32_0 : i32, i32
  }
  func.func @transform_7(%arg0: i32, %arg1: i32) -> (i32, i32) {
    %c0_i32 = arith.constant 0 : i32
    %c0_i32_0 = arith.constant 0 : i32
    %c0_i32_1 = arith.constant 0 : i32
    return %c0_i32, %c0_i32_0 : i32, i32
  }
  func.func @transform_8(%arg0: i32, %arg1: i32) -> (i32, i32) {
    %c0_i32 = arith.constant 0 : i32
    %c0_i32_0 = arith.constant 0 : i32
    %c0_i32_1 = arith.constant 0 : i32
    return %c0_i32, %c0_i32_0 : i32, i32
  }
  func.func @transform_9(%arg0: i32, %arg1: i32) -> (i32, i32) {
    %c0_i32 = arith.constant 0 : i32
    %c0_i32_0 = arith.constant 0 : i32
    %c0_i32_1 = arith.constant 0 : i32
    return %c0_i32, %c0_i32_0 : i32, i32
  }
  func.func @transform_10(%arg0: i32, %arg1: i32) -> (i32, i32) {
    %c0_i32 = arith.constant 0 : i32
    %c0_i32_0 = arith.constant 0 : i32
    %c0_i32_1 = arith.constant 0 : i32
    return %c0_i32, %c0_i32_0 : i32, i32
  }
  func.func @transform_11(%arg0: i32, %arg1: i32) -> (i32, i32) {
    %c0_i32 = arith.constant 0 : i32
    %c0_i32_0 = arith.constant 0 : i32
    %c0_i32_1 = arith.constant 0 : i32
    return %c0_i32, %c0_i32_0 : i32, i32
  }
  func.func @transform_12(%arg0: i32, %arg1: i32) -> (i32, i32) {
    %c0_i32 = arith.constant 0 : i32
    %c0_i32_0 = arith.constant 0 : i32
    %c0_i32_1 = arith.constant 0 : i32
    return %c0_i32, %c0_i32_0 : i32, i32
  }
  func.func @transform_13(%arg0: i32, %arg1: i32) -> (i32, i32) {
    %c0_i32 = arith.constant 0 : i32
    %c0_i32_0 = arith.constant 0 : i32
    %c0_i32_1 = arith.constant 0 : i32
    return %c0_i32, %c0_i32_0 : i32, i32
  }
  func.func @transform_14(%arg0: i32, %arg1: i32) -> (i32, i32) {
    %c0_i32 = arith.constant 0 : i32
    %c0_i32_0 = arith.constant 0 : i32
    %c0_i32_1 = arith.constant 0 : i32
    return %c0_i32, %c0_i32_0 : i32, i32
  }
  func.func @transform_15(%arg0: i32, %arg1: i32) -> (i32, i32, i32) {
    %c0_i32 = arith.constant 0 : i32
    %c0_i32_0 = arith.constant 0 : i32
    return %arg0, %arg1, %c0_i32 : i32, i32, i32
  }
}

module attributes {stable_mosaic.version = 11 : i64} {
  func.func @decoder_block_kernel(%arg0: i32, %arg1: i32, %arg2: memref<1x8x32xbf16, #tpu.memory_space<vmem>>, %arg3: memref<1x8x32xbf16, #tpu.memory_space<vmem>>, %arg4: memref<1x8x32xbf16, #tpu.memory_space<vmem>>, %arg5: memref<1x1x8xf32, #tpu.memory_space<vmem>>, %arg6: memref<1x1x8xf32, #tpu.memory_space<vmem>>, %arg7: memref<32x48xbf16, #tpu.memory_space<vmem>>, %arg8: memref<1x48xf32, #tpu.memory_space<vmem>>, %arg9: memref<16x32xbf16, #tpu.memory_space<vmem>>, %arg10: memref<1x32xf32, #tpu.memory_space<vmem>>, %arg11: memref<1x32xf32, #tpu.memory_space<vmem>>, %arg12: memref<1x32xf32, #tpu.memory_space<vmem>>, %arg13: memref<32x16xbf16, #tpu.memory_space<vmem>>, %arg14: memref<1x16xf32, #tpu.memory_space<vmem>>, %arg15: memref<32x32xbf16, #tpu.memory_space<vmem>>, %arg16: memref<1x32xf32, #tpu.memory_space<vmem>>, %arg17: memref<16x32xbf16, #tpu.memory_space<vmem>>, %arg18: memref<1x32xf32, #tpu.memory_space<vmem>>, %arg19: memref<1x32xf32, #tpu.memory_space<vmem>>, %arg20: memref<1x32xf32, #tpu.memory_space<vmem>>, %arg21: memref<32x64xbf16, #tpu.memory_space<vmem>>, %arg22: memref<1x64xf32, #tpu.memory_space<vmem>>, %arg23: memref<64x32xbf16, #tpu.memory_space<vmem>>, %arg24: memref<1x32xf32, #tpu.memory_space<vmem>>, %arg25: memref<1x32xf32, #tpu.memory_space<vmem>>, %arg26: memref<1x32xf32, #tpu.memory_space<vmem>>, %arg27: memref<1x8x32xbf16, #tpu.memory_space<vmem>>) attributes {dimension_semantics = [#tpu.dimension_semantics<parallel>, #tpu.dimension_semantics<parallel>], iteration_bounds = array<i64: 2, 1>, scalar_prefetch = 0 : i64, scratch_operands = 0 : i64, tpu.core_type = #tpu.core_type<tc>, window_params = [{transform_indices = @transform_0, window_bounds = array<i64: 1, 8, 32>}, {transform_indices = @transform_1, window_bounds = array<i64: 1, 8, 32>}, {transform_indices = @transform_2, window_bounds = array<i64: 1, 8, 32>}, {transform_indices = @transform_3, window_bounds = array<i64: 1, 1, 8>}, {transform_indices = @transform_4, window_bounds = array<i64: 1, 1, 8>}, {pipeline_mode = #tpu.pipeline_mode<synchronous>, transform_indices = @transform_5, window_bounds = array<i64: 32, 48>}, {pipeline_mode = #tpu.pipeline_mode<synchronous>, transform_indices = @transform_6, window_bounds = array<i64: 1, 48>}, {pipeline_mode = #tpu.pipeline_mode<synchronous>, transform_indices = @transform_7, window_bounds = array<i64: 16, 32>}, {pipeline_mode = #tpu.pipeline_mode<synchronous>, transform_indices = @transform_8, window_bounds = array<i64: 1, 32>}, {pipeline_mode = #tpu.pipeline_mode<synchronous>, transform_indices = @transform_9, window_bounds = array<i64: 1, 32>}, {pipeline_mode = #tpu.pipeline_mode<synchronous>, transform_indices = @transform_10, window_bounds = array<i64: 1, 32>}, {pipeline_mode = #tpu.pipeline_mode<synchronous>, transform_indices = @transform_11, window_bounds = array<i64: 32, 16>}, {pipeline_mode = #tpu.pipeline_mode<synchronous>, transform_indices = @transform_12, window_bounds = array<i64: 1, 16>}, {pipeline_mode = #tpu.pipeline_mode<synchronous>, transform_indices = @transform_13, window_bounds = array<i64: 32, 32>}, {pipeline_mode = #tpu.pipeline_mode<synchronous>, transform_indices = @transform_14, window_bounds = array<i64: 1, 32>}, {pipeline_mode = #tpu.pipeline_mode<synchronous>, transform_indices = @transform_15, window_bounds = array<i64: 16, 32>}, {pipeline_mode = #tpu.pipeline_mode<synchronous>, transform_indices = @transform_16, window_bounds = array<i64: 1, 32>}, {pipeline_mode = #tpu.pipeline_mode<synchronous>, transform_indices = @transform_17, window_bounds = array<i64: 1, 32>}, {pipeline_mode = #tpu.pipeline_mode<synchronous>, transform_indices = @transform_18, window_bounds = array<i64: 1, 32>}, {pipeline_mode = #tpu.pipeline_mode<synchronous>, transform_indices = @transform_19, window_bounds = array<i64: 32, 64>}, {pipeline_mode = #tpu.pipeline_mode<synchronous>, transform_indices = @transform_20, window_bounds = array<i64: 1, 64>}, {pipeline_mode = #tpu.pipeline_mode<synchronous>, transform_indices = @transform_21, window_bounds = array<i64: 64, 32>}, {pipeline_mode = #tpu.pipeline_mode<synchronous>, transform_indices = @transform_22, window_bounds = array<i64: 1, 32>}, {pipeline_mode = #tpu.pipeline_mode<synchronous>, transform_indices = @transform_23, window_bounds = array<i64: 1, 32>}, {pipeline_mode = #tpu.pipeline_mode<synchronous>, transform_indices = @transform_24, window_bounds = array<i64: 1, 32>}, {transform_indices = @transform_25, window_bounds = array<i64: 1, 8, 32>}]} {
    %c0 = arith.constant 0 : index
    %c0_0 = arith.constant 0 : index
    %c0_1 = arith.constant 0 : index
    %0 = vector.load %arg2[%c0, %c0_0, %c0_1] : memref<1x8x32xbf16, #tpu.memory_space<vmem>>, vector<1x8x32xbf16>
    %1 = vector.shape_cast %0 : vector<1x8x32xbf16> to vector<8x32xbf16>
    %c0_2 = arith.constant 0 : index
    %c0_3 = arith.constant 0 : index
    %c0_4 = arith.constant 0 : index
    %2 = vector.load %arg4[%c0_2, %c0_3, %c0_4] : memref<1x8x32xbf16, #tpu.memory_space<vmem>>, vector<1x8x32xbf16>
    %3 = vector.shape_cast %2 : vector<1x8x32xbf16> to vector<8x32xbf16>
    %c0_5 = arith.constant 0 : index
    %c0_6 = arith.constant 0 : index
    %c0_7 = arith.constant 0 : index
    %4 = vector.load %arg5[%c0_5, %c0_6, %c0_7] : memref<1x1x8xf32, #tpu.memory_space<vmem>>, vector<1x1x8xf32>
    %5 = vector.shape_cast %4 : vector<1x1x8xf32> to vector<1x8xf32>
    %c0_8 = arith.constant 0 : index
    %c0_9 = arith.constant 0 : index
    %c0_10 = arith.constant 0 : index
    %6 = vector.load %arg6[%c0_8, %c0_9, %c0_10] : memref<1x1x8xf32, #tpu.memory_space<vmem>>, vector<1x1x8xf32>
    %7 = vector.shape_cast %6 : vector<1x1x8xf32> to vector<1x8xf32>
    %c8_i32 = arith.constant 8 : i32
    %8 = arith.muli %arg1, %c8_i32 : i32
    %c0_11 = arith.constant 0 : index
    %c0_12 = arith.constant 0 : index
    %9 = vector.load %arg7[%c0_11, %c0_12] : memref<32x48xbf16, #tpu.memory_space<vmem>>, vector<32x48xbf16>
    %c0_13 = arith.constant 0 : index
    %c0_14 = arith.constant 0 : index
    %10 = vector.load %arg8[%c0_13, %c0_14] : memref<1x48xf32, #tpu.memory_space<vmem>>, vector<1x48xf32>
    %c0_15 = arith.constant 0 : index
    %c0_16 = arith.constant 0 : index
    %11 = vector.load %arg9[%c0_15, %c0_16] : memref<16x32xbf16, #tpu.memory_space<vmem>>, vector<16x32xbf16>
    %c0_17 = arith.constant 0 : index
    %c0_18 = arith.constant 0 : index
    %12 = vector.load %arg10[%c0_17, %c0_18] : memref<1x32xf32, #tpu.memory_space<vmem>>, vector<1x32xf32>
    %c0_19 = arith.constant 0 : index
    %c0_20 = arith.constant 0 : index
    %13 = vector.load %arg11[%c0_19, %c0_20] : memref<1x32xf32, #tpu.memory_space<vmem>>, vector<1x32xf32>
    %c0_21 = arith.constant 0 : index
    %c0_22 = arith.constant 0 : index
    %14 = vector.load %arg12[%c0_21, %c0_22] : memref<1x32xf32, #tpu.memory_space<vmem>>, vector<1x32xf32>
    %cst = arith.constant dense<0.000000e+00> : vector<8x48xf32>
    %15 = tpu.matmul %1, %9, %cst {dimension_numbers = #tpu.dot_dimension_numbers<[1], [0], [0], [1], [0, 0, 1, 1], [], []>} : vector<8x32xbf16>, vector<32x48xbf16>, vector<8x48xf32> -> vector<8x48xf32>
    %16 = vector.broadcast %10 : vector<1x48xf32> to vector<8x48xf32>
    %17 = arith.addf %15, %16 : vector<8x48xf32>
    %18 = vector.extract_strided_slice %17 {offsets = [0, 0], sizes = [8, 16], strides = [1, 1]} : vector<8x48xf32> to vector<8x16xf32>
    %19 = vector.extract_strided_slice %17 {offsets = [0, 16], sizes = [8, 16], strides = [1, 1]} : vector<8x48xf32> to vector<8x16xf32>
    %20 = vector.extract_strided_slice %17 {offsets = [0, 32], sizes = [8, 16], strides = [1, 1]} : vector<8x48xf32> to vector<8x16xf32>
    %21 = vector.shape_cast %18 : vector<8x16xf32> to vector<8x2x8xf32>
    %22 = tpu.transpose %21, [1, 0, 2] : vector<8x2x8xf32> -> vector<2x8x8xf32>
    %23 = arith.truncf %22 : vector<2x8x8xf32> to vector<2x8x8xbf16>
    %24 = vector.shape_cast %19 : vector<8x16xf32> to vector<8x2x8xf32>
    %25 = tpu.transpose %24, [1, 0, 2] : vector<8x2x8xf32> -> vector<2x8x8xf32>
    %26 = arith.truncf %25 : vector<2x8x8xf32> to vector<2x8x8xbf16>
    %27 = vector.shape_cast %20 : vector<8x16xf32> to vector<8x2x8xf32>
    %28 = tpu.transpose %27, [1, 0, 2] : vector<8x2x8xf32> -> vector<2x8x8xf32>
    %29 = arith.truncf %28 : vector<2x8x8xf32> to vector<2x8x8xbf16>
    "tpu.trace_start"() <{level = 10 : i32, message = "hqd,hkd->hqk"}> : () -> ()
    %cst_23 = arith.constant dense<0.000000e+00> : vector<2x8x8xf32>
    %30 = tpu.matmul %23, %26, %cst_23 {dimension_numbers = #tpu.dot_dimension_numbers<[2], [2], [1], [1], [0, 0, 0, 1, 1, 1], [0], [0]>} : vector<2x8x8xbf16>, vector<2x8x8xbf16>, vector<2x8x8xf32> -> vector<2x8x8xf32>
    "tpu.trace_stop"() : () -> ()
    %cst_24 = arith.constant 0.353553385 : f32
    %31 = vector.broadcast %cst_24 : f32 to vector<2x8x8xf32>
    %32 = arith.mulf %30, %31 : vector<2x8x8xf32>
    %cst_25 = arith.constant 5.000000e-01 : f32
    %33 = vector.broadcast %cst_25 : f32 to vector<1x8xf32>
    %34 = arith.cmpf ogt, %5, %33 : vector<1x8xf32>
    %35 = tpu.iota {dimensions = array<i32: 0>} : vector<8x8xi32>
    %36 = vector.broadcast %8 : i32 to vector<8x8xi32>
    %37 = arith.addi %35, %36 : vector<8x8xi32>
    %38 = tpu.iota {dimensions = array<i32: 1>} : vector<8x8xi32>
    %39 = arith.cmpi sgt, %38, %37 : vector<8x8xi32>
    %40 = vector.broadcast %34 : vector<1x8xi1> to vector<8x8xi1>
    %41 = arith.ori %40, %39 : vector<8x8xi1>
    %42 = vector.shape_cast %41 : vector<8x8xi1> to vector<1x8x8xi1>
    %43 = vector.broadcast %42 : vector<1x8x8xi1> to vector<2x8x8xi1>
    %cst_26 = arith.constant -1.000000e+09 : f32
    %44 = vector.broadcast %cst_26 : f32 to vector<2x8x8xf32>
    %45 = arith.select %43, %44, %32 : vector<2x8x8xi1>, vector<2x8x8xf32>
    %cst_27 = arith.constant dense<0xFF800000> : vector<2x8xf32>
    %46 = vector.multi_reduction <maximumf>, %45, %cst_27 [2] : vector<2x8x8xf32> to vector<2x8xf32>
    %47 = vector.shape_cast %46 : vector<2x8xf32> to vector<2x8x1xf32>
    %48 = vector.broadcast %47 : vector<2x8x1xf32> to vector<2x8x8xf32>
    %49 = arith.subf %45, %48 : vector<2x8x8xf32>
    %50 = math.exp %49 : vector<2x8x8xf32>
    %cst_28 = arith.constant dense<0.000000e+00> : vector<2x8xf32>
    %51 = vector.multi_reduction <add>, %50, %cst_28 [2] : vector<2x8x8xf32> to vector<2x8xf32>
    %52 = vector.shape_cast %51 : vector<2x8xf32> to vector<2x8x1xf32>
    %53 = tpu.reciprocal %52 {approx = true} : vector<2x8x1xf32> -> vector<2x8x1xf32>
    %54 = vector.broadcast %53 : vector<2x8x1xf32> to vector<2x8x8xf32>
    %55 = arith.mulf %50, %54 : vector<2x8x8xf32>
    %56 = arith.truncf %55 : vector<2x8x8xf32> to vector<2x8x8xbf16>
    "tpu.trace_start"() <{level = 10 : i32, message = "hqk,hkd->hqd"}> : () -> ()
    %cst_29 = arith.constant dense<0.000000e+00> : vector<2x8x8xf32>
    %57 = tpu.matmul %56, %29, %cst_29 {dimension_numbers = #tpu.dot_dimension_numbers<[2], [1], [1], [2], [0, 0, 0, 1, 1, 2], [0], [0]>} : vector<2x8x8xbf16>, vector<2x8x8xbf16>, vector<2x8x8xf32> -> vector<2x8x8xf32>
    "tpu.trace_stop"() : () -> ()
    %58 = tpu.transpose %57, [1, 0, 2] : vector<2x8x8xf32> -> vector<8x2x8xf32>
    %59 = vector.shape_cast %58 : vector<8x2x8xf32> to vector<8x16xf32>
    %60 = arith.truncf %59 : vector<8x16xf32> to vector<8x16xbf16>
    %cst_30 = arith.constant dense<0.000000e+00> : vector<8x32xf32>
    %61 = tpu.matmul %60, %11, %cst_30 {dimension_numbers = #tpu.dot_dimension_numbers<[1], [0], [0], [1], [0, 0, 1, 1], [], []>} : vector<8x16xbf16>, vector<16x32xbf16>, vector<8x32xf32> -> vector<8x32xf32>
    %62 = vector.broadcast %12 : vector<1x32xf32> to vector<8x32xf32>
    %63 = arith.addf %61, %62 : vector<8x32xf32>
    %64 = arith.extf %1 : vector<8x32xbf16> to vector<8x32xf32>
    %65 = arith.addf %63, %64 : vector<8x32xf32>
    %cst_31 = arith.constant dense<0.000000e+00> : vector<8xf32>
    %66 = vector.multi_reduction <add>, %65, %cst_31 [1] : vector<8x32xf32> to vector<8xf32>
    %67 = vector.shape_cast %66 : vector<8xf32> to vector<8x1xf32>
    %cst_32 = arith.constant 3.200000e+01 : f32
    %68 = vector.broadcast %cst_32 : f32 to vector<8x1xf32>
    %69 = arith.divf %67, %68 : vector<8x1xf32>
    %70 = vector.broadcast %69 : vector<8x1xf32> to vector<8x32xf32>
    %71 = arith.subf %65, %70 : vector<8x32xf32>
    %72 = arith.mulf %71, %71 : vector<8x32xf32>
    %cst_33 = arith.constant dense<0.000000e+00> : vector<8xf32>
    %73 = vector.multi_reduction <add>, %72, %cst_33 [1] : vector<8x32xf32> to vector<8xf32>
    %74 = vector.shape_cast %73 : vector<8xf32> to vector<8x1xf32>
    %cst_34 = arith.constant 3.200000e+01 : f32
    %75 = vector.broadcast %cst_34 : f32 to vector<8x1xf32>
    %76 = arith.divf %74, %75 : vector<8x1xf32>
    %77 = vector.broadcast %69 : vector<8x1xf32> to vector<8x32xf32>
    %78 = arith.subf %65, %77 : vector<8x32xf32>
    %cst_35 = arith.constant 9.99999974E-6 : f32
    %79 = vector.broadcast %cst_35 : f32 to vector<8x1xf32>
    %80 = arith.addf %76, %79 : vector<8x1xf32>
    %81 = math.rsqrt %80 : vector<8x1xf32>
    %82 = vector.broadcast %81 : vector<8x1xf32> to vector<8x32xf32>
    %83 = arith.mulf %78, %82 : vector<8x32xf32>
    %84 = vector.broadcast %13 : vector<1x32xf32> to vector<8x32xf32>
    %85 = arith.mulf %83, %84 : vector<8x32xf32>
    %86 = vector.broadcast %14 : vector<1x32xf32> to vector<8x32xf32>
    %87 = arith.addf %85, %86 : vector<8x32xf32>
    %c0_36 = arith.constant 0 : index
    %c0_37 = arith.constant 0 : index
    %88 = vector.load %arg13[%c0_36, %c0_37] : memref<32x16xbf16, #tpu.memory_space<vmem>>, vector<32x16xbf16>
    %c0_38 = arith.constant 0 : index
    %c0_39 = arith.constant 0 : index
    %89 = vector.load %arg14[%c0_38, %c0_39] : memref<1x16xf32, #tpu.memory_space<vmem>>, vector<1x16xf32>
    %c0_40 = arith.constant 0 : index
    %c0_41 = arith.constant 0 : index
    %90 = vector.load %arg15[%c0_40, %c0_41] : memref<32x32xbf16, #tpu.memory_space<vmem>>, vector<32x32xbf16>
    %c0_42 = arith.constant 0 : index
    %c0_43 = arith.constant 0 : index
    %91 = vector.load %arg16[%c0_42, %c0_43] : memref<1x32xf32, #tpu.memory_space<vmem>>, vector<1x32xf32>
    %c0_44 = arith.constant 0 : index
    %c0_45 = arith.constant 0 : index
    %92 = vector.load %arg17[%c0_44, %c0_45] : memref<16x32xbf16, #tpu.memory_space<vmem>>, vector<16x32xbf16>
    %c0_46 = arith.constant 0 : index
    %c0_47 = arith.constant 0 : index
    %93 = vector.load %arg18[%c0_46, %c0_47] : memref<1x32xf32, #tpu.memory_space<vmem>>, vector<1x32xf32>
    %c0_48 = arith.constant 0 : index
    %c0_49 = arith.constant 0 : index
    %94 = vector.load %arg19[%c0_48, %c0_49] : memref<1x32xf32, #tpu.memory_space<vmem>>, vector<1x32xf32>
    %c0_50 = arith.constant 0 : index
    %c0_51 = arith.constant 0 : index
    %95 = vector.load %arg20[%c0_50, %c0_51] : memref<1x32xf32, #tpu.memory_space<vmem>>, vector<1x32xf32>
    %96 = arith.truncf %87 : vector<8x32xf32> to vector<8x32xbf16>
    %cst_52 = arith.constant dense<0.000000e+00> : vector<8x16xf32>
    %97 = tpu.matmul %96, %88, %cst_52 {dimension_numbers = #tpu.dot_dimension_numbers<[1], [0], [0], [1], [0, 0, 1, 1], [], []>} : vector<8x32xbf16>, vector<32x16xbf16>, vector<8x16xf32> -> vector<8x16xf32>
    %98 = vector.broadcast %89 : vector<1x16xf32> to vector<8x16xf32>
    %99 = arith.addf %97, %98 : vector<8x16xf32>
    %cst_53 = arith.constant dense<0.000000e+00> : vector<8x32xf32>
    %100 = tpu.matmul %3, %90, %cst_53 {dimension_numbers = #tpu.dot_dimension_numbers<[1], [0], [0], [1], [0, 0, 1, 1], [], []>} : vector<8x32xbf16>, vector<32x32xbf16>, vector<8x32xf32> -> vector<8x32xf32>
    %101 = vector.broadcast %91 : vector<1x32xf32> to vector<8x32xf32>
    %102 = arith.addf %100, %101 : vector<8x32xf32>
    %103 = vector.extract_strided_slice %102 {offsets = [0, 0], sizes = [8, 16], strides = [1, 1]} : vector<8x32xf32> to vector<8x16xf32>
    %104 = vector.extract_strided_slice %102 {offsets = [0, 16], sizes = [8, 16], strides = [1, 1]} : vector<8x32xf32> to vector<8x16xf32>
    %105 = vector.shape_cast %99 : vector<8x16xf32> to vector<8x2x8xf32>
    %106 = tpu.transpose %105, [1, 0, 2] : vector<8x2x8xf32> -> vector<2x8x8xf32>
    %107 = arith.truncf %106 : vector<2x8x8xf32> to vector<2x8x8xbf16>
    %108 = vector.shape_cast %103 : vector<8x16xf32> to vector<8x2x8xf32>
    %109 = tpu.transpose %108, [1, 0, 2] : vector<8x2x8xf32> -> vector<2x8x8xf32>
    %110 = arith.truncf %109 : vector<2x8x8xf32> to vector<2x8x8xbf16>
    %111 = vector.shape_cast %104 : vector<8x16xf32> to vector<8x2x8xf32>
    %112 = tpu.transpose %111, [1, 0, 2] : vector<8x2x8xf32> -> vector<2x8x8xf32>
    %113 = arith.truncf %112 : vector<2x8x8xf32> to vector<2x8x8xbf16>
    "tpu.trace_start"() <{level = 10 : i32, message = "hqd,hkd->hqk"}> : () -> ()
    %cst_54 = arith.constant dense<0.000000e+00> : vector<2x8x8xf32>
    %114 = tpu.matmul %107, %110, %cst_54 {dimension_numbers = #tpu.dot_dimension_numbers<[2], [2], [1], [1], [0, 0, 0, 1, 1, 1], [0], [0]>} : vector<2x8x8xbf16>, vector<2x8x8xbf16>, vector<2x8x8xf32> -> vector<2x8x8xf32>
    "tpu.trace_stop"() : () -> ()
    %cst_55 = arith.constant 0.353553385 : f32
    %115 = vector.broadcast %cst_55 : f32 to vector<2x8x8xf32>
    %116 = arith.mulf %114, %115 : vector<2x8x8xf32>
    %cst_56 = arith.constant 5.000000e-01 : f32
    %117 = vector.broadcast %cst_56 : f32 to vector<1x8xf32>
    %118 = arith.cmpf ogt, %7, %117 : vector<1x8xf32>
    %119 = vector.shape_cast %118 : vector<1x8xi1> to vector<1x1x8xi1>
    %120 = vector.broadcast %119 : vector<1x1x8xi1> to vector<2x8x8xi1>
    %cst_57 = arith.constant -1.000000e+09 : f32
    %121 = vector.broadcast %cst_57 : f32 to vector<2x8x8xf32>
    %122 = arith.select %120, %121, %116 : vector<2x8x8xi1>, vector<2x8x8xf32>
    %cst_58 = arith.constant dense<0xFF800000> : vector<2x8xf32>
    %123 = vector.multi_reduction <maximumf>, %122, %cst_58 [2] : vector<2x8x8xf32> to vector<2x8xf32>
    %124 = vector.shape_cast %123 : vector<2x8xf32> to vector<2x8x1xf32>
    %125 = vector.broadcast %124 : vector<2x8x1xf32> to vector<2x8x8xf32>
    %126 = arith.subf %122, %125 : vector<2x8x8xf32>
    %127 = math.exp %126 : vector<2x8x8xf32>
    %cst_59 = arith.constant dense<0.000000e+00> : vector<2x8xf32>
    %128 = vector.multi_reduction <add>, %127, %cst_59 [2] : vector<2x8x8xf32> to vector<2x8xf32>
    %129 = vector.shape_cast %128 : vector<2x8xf32> to vector<2x8x1xf32>
    %130 = tpu.reciprocal %129 {approx = true} : vector<2x8x1xf32> -> vector<2x8x1xf32>
    %131 = vector.broadcast %130 : vector<2x8x1xf32> to vector<2x8x8xf32>
    %132 = arith.mulf %127, %131 : vector<2x8x8xf32>
    %133 = arith.truncf %132 : vector<2x8x8xf32> to vector<2x8x8xbf16>
    "tpu.trace_start"() <{level = 10 : i32, message = "hqk,hkd->hqd"}> : () -> ()
    %cst_60 = arith.constant dense<0.000000e+00> : vector<2x8x8xf32>
    %134 = tpu.matmul %133, %113, %cst_60 {dimension_numbers = #tpu.dot_dimension_numbers<[2], [1], [1], [2], [0, 0, 0, 1, 1, 2], [0], [0]>} : vector<2x8x8xbf16>, vector<2x8x8xbf16>, vector<2x8x8xf32> -> vector<2x8x8xf32>
    "tpu.trace_stop"() : () -> ()
    %135 = tpu.transpose %134, [1, 0, 2] : vector<2x8x8xf32> -> vector<8x2x8xf32>
    %136 = vector.shape_cast %135 : vector<8x2x8xf32> to vector<8x16xf32>
    %137 = arith.truncf %136 : vector<8x16xf32> to vector<8x16xbf16>
    %cst_61 = arith.constant dense<0.000000e+00> : vector<8x32xf32>
    %138 = tpu.matmul %137, %92, %cst_61 {dimension_numbers = #tpu.dot_dimension_numbers<[1], [0], [0], [1], [0, 0, 1, 1], [], []>} : vector<8x16xbf16>, vector<16x32xbf16>, vector<8x32xf32> -> vector<8x32xf32>
    %139 = vector.broadcast %93 : vector<1x32xf32> to vector<8x32xf32>
    %140 = arith.addf %138, %139 : vector<8x32xf32>
    %141 = arith.addf %140, %87 : vector<8x32xf32>
    %cst_62 = arith.constant dense<0.000000e+00> : vector<8xf32>
    %142 = vector.multi_reduction <add>, %141, %cst_62 [1] : vector<8x32xf32> to vector<8xf32>
    %143 = vector.shape_cast %142 : vector<8xf32> to vector<8x1xf32>
    %cst_63 = arith.constant 3.200000e+01 : f32
    %144 = vector.broadcast %cst_63 : f32 to vector<8x1xf32>
    %145 = arith.divf %143, %144 : vector<8x1xf32>
    %146 = vector.broadcast %145 : vector<8x1xf32> to vector<8x32xf32>
    %147 = arith.subf %141, %146 : vector<8x32xf32>
    %148 = arith.mulf %147, %147 : vector<8x32xf32>
    %cst_64 = arith.constant dense<0.000000e+00> : vector<8xf32>
    %149 = vector.multi_reduction <add>, %148, %cst_64 [1] : vector<8x32xf32> to vector<8xf32>
    %150 = vector.shape_cast %149 : vector<8xf32> to vector<8x1xf32>
    %cst_65 = arith.constant 3.200000e+01 : f32
    %151 = vector.broadcast %cst_65 : f32 to vector<8x1xf32>
    %152 = arith.divf %150, %151 : vector<8x1xf32>
    %153 = vector.broadcast %145 : vector<8x1xf32> to vector<8x32xf32>
    %154 = arith.subf %141, %153 : vector<8x32xf32>
    %cst_66 = arith.constant 9.99999974E-6 : f32
    %155 = vector.broadcast %cst_66 : f32 to vector<8x1xf32>
    %156 = arith.addf %152, %155 : vector<8x1xf32>
    %157 = math.rsqrt %156 : vector<8x1xf32>
    %158 = vector.broadcast %157 : vector<8x1xf32> to vector<8x32xf32>
    %159 = arith.mulf %154, %158 : vector<8x32xf32>
    %160 = vector.broadcast %94 : vector<1x32xf32> to vector<8x32xf32>
    %161 = arith.mulf %159, %160 : vector<8x32xf32>
    %162 = vector.broadcast %95 : vector<1x32xf32> to vector<8x32xf32>
    %163 = arith.addf %161, %162 : vector<8x32xf32>
    %c0_67 = arith.constant 0 : index
    %c0_68 = arith.constant 0 : index
    %164 = vector.load %arg21[%c0_67, %c0_68] : memref<32x64xbf16, #tpu.memory_space<vmem>>, vector<32x64xbf16>
    %c0_69 = arith.constant 0 : index
    %c0_70 = arith.constant 0 : index
    %165 = vector.load %arg22[%c0_69, %c0_70] : memref<1x64xf32, #tpu.memory_space<vmem>>, vector<1x64xf32>
    %c0_71 = arith.constant 0 : index
    %c0_72 = arith.constant 0 : index
    %166 = vector.load %arg23[%c0_71, %c0_72] : memref<64x32xbf16, #tpu.memory_space<vmem>>, vector<64x32xbf16>
    %c0_73 = arith.constant 0 : index
    %c0_74 = arith.constant 0 : index
    %167 = vector.load %arg24[%c0_73, %c0_74] : memref<1x32xf32, #tpu.memory_space<vmem>>, vector<1x32xf32>
    %c0_75 = arith.constant 0 : index
    %c0_76 = arith.constant 0 : index
    %168 = vector.load %arg25[%c0_75, %c0_76] : memref<1x32xf32, #tpu.memory_space<vmem>>, vector<1x32xf32>
    %c0_77 = arith.constant 0 : index
    %c0_78 = arith.constant 0 : index
    %169 = vector.load %arg26[%c0_77, %c0_78] : memref<1x32xf32, #tpu.memory_space<vmem>>, vector<1x32xf32>
    %170 = arith.truncf %163 : vector<8x32xf32> to vector<8x32xbf16>
    %cst_79 = arith.constant dense<0.000000e+00> : vector<8x64xf32>
    %171 = tpu.matmul %170, %164, %cst_79 {dimension_numbers = #tpu.dot_dimension_numbers<[1], [0], [0], [1], [0, 0, 1, 1], [], []>} : vector<8x32xbf16>, vector<32x64xbf16>, vector<8x64xf32> -> vector<8x64xf32>
    %172 = vector.broadcast %165 : vector<1x64xf32> to vector<8x64xf32>
    %173 = arith.addf %171, %172 : vector<8x64xf32>
    %cst_80 = arith.constant 0.000000e+00 : f32
    %174 = vector.broadcast %cst_80 : f32 to vector<8x64xf32>
    %175 = arith.maximumf %173, %174 : vector<8x64xf32>
    %176 = arith.truncf %175 : vector<8x64xf32> to vector<8x64xbf16>
    %cst_81 = arith.constant dense<0.000000e+00> : vector<8x32xf32>
    %177 = tpu.matmul %176, %166, %cst_81 {dimension_numbers = #tpu.dot_dimension_numbers<[1], [0], [0], [1], [0, 0, 1, 1], [], []>} : vector<8x64xbf16>, vector<64x32xbf16>, vector<8x32xf32> -> vector<8x32xf32>
    %178 = vector.broadcast %167 : vector<1x32xf32> to vector<8x32xf32>
    %179 = arith.addf %177, %178 : vector<8x32xf32>
    %180 = arith.addf %179, %163 : vector<8x32xf32>
    %cst_82 = arith.constant dense<0.000000e+00> : vector<8xf32>
    %181 = vector.multi_reduction <add>, %180, %cst_82 [1] : vector<8x32xf32> to vector<8xf32>
    %182 = vector.shape_cast %181 : vector<8xf32> to vector<8x1xf32>
    %cst_83 = arith.constant 3.200000e+01 : f32
    %183 = vector.broadcast %cst_83 : f32 to vector<8x1xf32>
    %184 = arith.divf %182, %183 : vector<8x1xf32>
    %185 = vector.broadcast %184 : vector<8x1xf32> to vector<8x32xf32>
    %186 = arith.subf %180, %185 : vector<8x32xf32>
    %187 = arith.mulf %186, %186 : vector<8x32xf32>
    %cst_84 = arith.constant dense<0.000000e+00> : vector<8xf32>
    %188 = vector.multi_reduction <add>, %187, %cst_84 [1] : vector<8x32xf32> to vector<8xf32>
    %189 = vector.shape_cast %188 : vector<8xf32> to vector<8x1xf32>
    %cst_85 = arith.constant 3.200000e+01 : f32
    %190 = vector.broadcast %cst_85 : f32 to vector<8x1xf32>
    %191 = arith.divf %189, %190 : vector<8x1xf32>
    %192 = vector.broadcast %184 : vector<8x1xf32> to vector<8x32xf32>
    %193 = arith.subf %180, %192 : vector<8x32xf32>
    %cst_86 = arith.constant 9.99999974E-6 : f32
    %194 = vector.broadcast %cst_86 : f32 to vector<8x1xf32>
    %195 = arith.addf %191, %194 : vector<8x1xf32>
    %196 = math.rsqrt %195 : vector<8x1xf32>
    %197 = vector.broadcast %196 : vector<8x1xf32> to vector<8x32xf32>
    %198 = arith.mulf %193, %197 : vector<8x32xf32>
    %199 = vector.broadcast %168 : vector<1x32xf32> to vector<8x32xf32>
    %200 = arith.mulf %198, %199 : vector<8x32xf32>
    %201 = vector.broadcast %169 : vector<1x32xf32> to vector<8x32xf32>
    %202 = arith.addf %200, %201 : vector<8x32xf32>
    %203 = arith.truncf %202 : vector<8x32xf32> to vector<8x32xbf16>
    %c0_87 = arith.constant 0 : index
    %c0_88 = arith.constant 0 : index
    %c0_89 = arith.constant 0 : index
    %204 = vector.load %arg27[%c0_87, %c0_88, %c0_89] : memref<1x8x32xbf16, #tpu.memory_space<vmem>>, vector<1x8x32xbf16>
    %205 = vector.shape_cast %204 : vector<1x8x32xbf16> to vector<8x32xbf16>
    %206 = vector.shape_cast %203 : vector<8x32xbf16> to vector<1x8x32xbf16>
    tpu.vector_store %arg27[%c0_87, %c0_88, %c0_89], %206 {strides = array<i32>} : memref<1x8x32xbf16, #tpu.memory_space<vmem>>, vector<1x8x32xbf16>,
    return
  }
  func.func @transform_0(%arg0: i32, %arg1: i32) -> (i32, i32, i32) {
    %c0_i32 = arith.constant 0 : i32
    %c0_i32_0 = arith.constant 0 : i32
    return %arg0, %arg1, %c0_i32 : i32, i32, i32
  }
  func.func @transform_1(%arg0: i32, %arg1: i32) -> (i32, i32, i32) {
    %c0_i32 = arith.constant 0 : i32
    %c0_i32_0 = arith.constant 0 : i32
    %c0_i32_1 = arith.constant 0 : i32
    return %arg0, %c0_i32, %c0_i32_0 : i32, i32, i32
  }
  func.func @transform_2(%arg0: i32, %arg1: i32) -> (i32, i32, i32) {
    %c0_i32 = arith.constant 0 : i32
    %c0_i32_0 = arith.constant 0 : i32
    %c0_i32_1 = arith.constant 0 : i32
    return %arg0, %c0_i32, %c0_i32_0 : i32, i32, i32
  }
  func.func @transform_3(%arg0: i32, %arg1: i32) -> (i32, i32, i32) {
    %c0_i32 = arith.constant 0 : i32
    %c0_i32_0 = arith.constant 0 : i32
    %c0_i32_1 = arith.constant 0 : i32
    return %arg0, %c0_i32, %c0_i32_0 : i32, i32, i32
  }
  func.func @transform_4(%arg0: i32, %arg1: i32) -> (i32, i32, i32) {
    %c0_i32 = arith.constant 0 : i32
    %c0_i32_0 = arith.constant 0 : i32
    %c0_i32_1 = arith.constant 0 : i32
    return %arg0, %c0_i32, %c0_i32_0 : i32, i32, i32
  }
  func.func @transform_5(%arg0: i32, %arg1: i32) -> (i32, i32) {
    %c0_i32 = arith.constant 0 : i32
    %c0_i32_0 = arith.constant 0 : i32
    %c0_i32_1 = arith.constant 0 : i32
    return %c0_i32, %c0_i32_0 : i32, i32
  }
  func.func @transform_6(%arg0: i32, %arg1: i32) -> (i32, i32) {
    %c0_i32 = arith.constant 0 : i32
    %c0_i32_0 = arith.constant 0 : i32
    %c0_i32_1 = arith.constant 0 : i32
    return %c0_i32, %c0_i32_0 : i32, i32
  }
  func.func @transform_7(%arg0: i32, %arg1: i32) -> (i32, i32) {
    %c0_i32 = arith.constant 0 : i32
    %c0_i32_0 = arith.constant 0 : i32
    %c0_i32_1 = arith.constant 0 : i32
    return %c0_i32, %c0_i32_0 : i32, i32
  }
  func.func @transform_8(%arg0: i32, %arg1: i32) -> (i32, i32) {
    %c0_i32 = arith.constant 0 : i32
    %c0_i32_0 = arith.constant 0 : i32
    %c0_i32_1 = arith.constant 0 : i32
    return %c0_i32, %c0_i32_0 : i32, i32
  }
  func.func @transform_9(%arg0: i32, %arg1: i32) -> (i32, i32) {
    %c0_i32 = arith.constant 0 : i32
    %c0_i32_0 = arith.constant 0 : i32
    %c0_i32_1 = arith.constant 0 : i32
    return %c0_i32, %c0_i32_0 : i32, i32
  }
  func.func @transform_10(%arg0: i32, %arg1: i32) -> (i32, i32) {
    %c0_i32 = arith.constant 0 : i32
    %c0_i32_0 = arith.constant 0 : i32
    %c0_i32_1 = arith.constant 0 : i32
    return %c0_i32, %c0_i32_0 : i32, i32
  }
  func.func @transform_11(%arg0: i32, %arg1: i32) -> (i32, i32) {
    %c0_i32 = arith.constant 0 : i32
    %c0_i32_0 = arith.constant 0 : i32
    %c0_i32_1 = arith.constant 0 : i32
    return %c0_i32, %c0_i32_0 : i32, i32
  }
  func.func @transform_12(%arg0: i32, %arg1: i32) -> (i32, i32) {
    %c0_i32 = arith.constant 0 : i32
    %c0_i32_0 = arith.constant 0 : i32
    %c0_i32_1 = arith.constant 0 : i32
    return %c0_i32, %c0_i32_0 : i32, i32
  }
  func.func @transform_13(%arg0: i32, %arg1: i32) -> (i32, i32) {
    %c0_i32 = arith.constant 0 : i32
    %c0_i32_0 = arith.constant 0 : i32
    %c0_i32_1 = arith.constant 0 : i32
    return %c0_i32, %c0_i32_0 : i32, i32
  }
  func.func @transform_14(%arg0: i32, %arg1: i32) -> (i32, i32) {
    %c0_i32 = arith.constant 0 : i32
    %c0_i32_0 = arith.constant 0 : i32
    %c0_i32_1 = arith.constant 0 : i32
    return %c0_i32, %c0_i32_0 : i32, i32
  }
  func.func @transform_15(%arg0: i32, %arg1: i32) -> (i32, i32) {
    %c0_i32 = arith.constant 0 : i32
    %c0_i32_0 = arith.constant 0 : i32
    %c0_i32_1 = arith.constant 0 : i32
    return %c0_i32, %c0_i32_0 : i32, i32
  }
  func.func @transform_16(%arg0: i32, %arg1: i32) -> (i32, i32) {
    %c0_i32 = arith.constant 0 : i32
    %c0_i32_0 = arith.constant 0 : i32
    %c0_i32_1 = arith.constant 0 : i32
    return %c0_i32, %c0_i32_0 : i32, i32
  }
  func.func @transform_17(%arg0: i32, %arg1: i32) -> (i32, i32) {
    %c0_i32 = arith.constant 0 : i32
    %c0_i32_0 = arith.constant 0 : i32
    %c0_i32_1 = arith.constant 0 : i32
    return %c0_i32, %c0_i32_0 : i32, i32
  }
  func.func @transform_18(%arg0: i32, %arg1: i32) -> (i32, i32) {
    %c0_i32 = arith.constant 0 : i32
    %c0_i32_0 = arith.constant 0 : i32
    %c0_i32_1 = arith.constant 0 : i32
    return %c0_i32, %c0_i32_0 : i32, i32
  }
  func.func @transform_19(%arg0: i32, %arg1: i32) -> (i32, i32) {
    %c0_i32 = arith.constant 0 : i32
    %c0_i32_0 = arith.constant 0 : i32
    %c0_i32_1 = arith.constant 0 : i32
    return %c0_i32, %c0_i32_0 : i32, i32
  }
  func.func @transform_20(%arg0: i32, %arg1: i32) -> (i32, i32) {
    %c0_i32 = arith.constant 0 : i32
    %c0_i32_0 = arith.constant 0 : i32
    %c0_i32_1 = arith.constant 0 : i32
    return %c0_i32, %c0_i32_0 : i32, i32
  }
  func.func @transform_21(%arg0: i32, %arg1: i32) -> (i32, i32) {
    %c0_i32 = arith.constant 0 : i32
    %c0_i32_0 = arith.constant 0 : i32
    %c0_i32_1 = arith.constant 0 : i32
    return %c0_i32, %c0_i32_0 : i32, i32
  }
  func.func @transform_22(%arg0: i32, %arg1: i32) -> (i32, i32) {
    %c0_i32 = arith.constant 0 : i32
    %c0_i32_0 = arith.constant 0 : i32
    %c0_i32_1 = arith.constant 0 : i32
    return %c0_i32, %c0_i32_0 : i32, i32
  }
  func.func @transform_23(%arg0: i32, %arg1: i32) -> (i32, i32) {
    %c0_i32 = arith.constant 0 : i32
    %c0_i32_0 = arith.constant 0 : i32
    %c0_i32_1 = arith.constant 0 : i32
    return %c0_i32, %c0_i32_0 : i32, i32
  }
  func.func @transform_24(%arg0: i32, %arg1: i32) -> (i32, i32) {
    %c0_i32 = arith.constant 0 : i32
    %c0_i32_0 = arith.constant 0 : i32
    %c0_i32_1 = arith.constant 0 : i32
    return %c0_i32, %c0_i32_0 : i32, i32
  }
  func.func @transform_25(%arg0: i32, %arg1: i32) -> (i32, i32, i32) {
    %c0_i32 = arith.constant 0 : i32
    %c0_i32_0 = arith.constant 0 : i32
    return %arg0, %arg1, %c0_i32 : i32, i32, i32
  }
}

</mosaic_0001>

<bundles_post_ra>
// kernel: transformer_forward.9
= control target key start
LH: loop header
LB: loop body
LE: loop exit
PB: predicated region body
PF: predicated region fallthrough
CT: control target
= control target key end

     0   :  { %v117_v0 = vmov 0.0   ;;  %vm118_vm0 = vmmov 0   ;;  %vm45_vm1 = vcmask 261120   ;;  %s157_s1 = inlined_call_operand.vmem [shape: bf16[32,128], index: 1, kind: input, shape index: {}]   ;;  %s158_s0 = inlined_call_operand.vmem [shape: bf16[16,32], index: 0, kind: input, shape index: {}]   ;;  %s159_s2 = inlined_call_operand.vmem [shape: f32[1,128], index: 2, kind: input, shape index: {}]   ;;  %s160_s3 = inlined_call_operand.vmem [shape: f32[16,128], index: 3, kind: output, shape index: {}]  }
   0x1   :  { %104 = vmatprep.subr.bf16.mxu0 %v117_v0  ;;  %v114_v1 = vld [vmem:[%s157_s1] sm:$0xff]   ;;  %108 = vmatprep.mubr.msk.bf16.mxu0 %vm118_vm0, %v117_v0  ;;  %v115_v2 = vld [vmem:[%s157_s1 + $0x8] sm:$0xff]  }
   0x2   :  { %105 = vmatpush3.bf16.msra.mxu0 %v114_v1  ;;  %v116_v3 = vld [vmem:[%s158_s0] sm:$0xff]  }
   0x3   :  { %106 = vmatprep.subr.bf16.mxu0 %v117_v0  ;;  %v96_v4 = vld [vmem:[%s159_s2] ss:$0 sm:$0xff] }
   0x6   :  { %107 = vmatpush3.bf16.msra.mxu0 %v115_v2 }
   0x9   :  { %109 = vmatmul.mubr.msk.bf16.vlgmr.msra.gmra.mrb[0].mxu0 %vm45_vm1, %v116_v3 }
  0xdc   :  { %v83_v5 = vpop.f32.mrb[0].mxu0 }
  0xdd   :  { %v84_v6 = vadd.f32 %v96_v4, %v83_v5  ;;  %v110_v7 = vpop.f32.mrb[1].mxu0 }
  0xde   :  { %v86_v8 = vpop.f32.mrb[2].mxu0 }
  0xdf   :  { %90 = vst [vmem:[%s160_s3] sm:$0xff] %v84_v6  ;;  %v87_v9 = vadd.f32 %v96_v4, %v86_v8  ;;  %v111_v10 = vpop.f32.mrb[3].mxu0 }
  0xe1   :  { %91 = vst [vmem:[%s160_s3 + $0x8] sm:$0xff] %v87_v9 }

// kernel: transformer_forward.5
= control target key start
LH: loop header
LB: loop body
LE: loop exit
PB: predicated region body
PF: predicated region fallthrough
CT: control target
= control target key end

     0   :  { %s1994_s17 = smov 0   ;;  %s1996_s1 = smov 0   ;;  %s2225_s0 = inlined_call_operand.vmem [shape: bf16[2,8,32], index: 0, kind: input, shape index: {}, may-alias: {0,1}]   ;;  %s2226_s1 = inlined_call_operand.vmem [shape: bf16[2,8,32], index: 1, kind: input, shape index: {}, may-alias: {0,1}]   ;;  %s2227_s2 = inlined_call_operand.vmem [shape: f32[2,1,8], index: 2, kind: input, shape index: {}]   ;;  %s2228_s3 = inlined_call_operand.vmem [shape: bf16[32,48], index: 3, kind: input, shape index: {}]   ;;  %s2229_s4 = inlined_call_operand.vmem [shape: f32[1,48], index: 4, kind: input, shape index: {}]   ;;  %s2230_s5 = inlined_call_operand.vmem [shape: bf16[16,32], index: 5, kind: input, shape index: {}]   ;;  %s2231_s6 = inlined_call_operand.vmem [shape: f32[1,32], index: 6, kind: input, shape index: {}]   ;;  %s2232_s7 = inlined_call_operand.vmem [shape: f32[1,32], index: 7, kind: input, shape index: {}]   ;;  %s2233_s8 = inlined_call_operand.vmem [shape: f32[1,32], index: 8, kind: input, shape index: {}]   ;;  %s2234_s9 = inlined_call_operand.vmem [shape: bf16[32,64], index: 9, kind: input, shape index: {}]   ;;  %s2235_s10 = inlined_call_operand.vmem [shape: f32[1,64], index: 10, kind: input, shape index: {}]   ;;  %s2236_s11 = inlined_call_operand.vmem [shape: bf16[64,32], index: 11, kind: input, shape index: {}]   ;;  %s2237_s12 = inlined_call_operand.vmem [shape: f32[1,32], index: 12, kind: input, shape index: {}]   ;;  %s2238_s13 = inlined_call_operand.vmem [shape: f32[1,32], index: 13, kind: input, shape index: {}]   ;;  %s2239_s14 = inlined_call_operand.vmem [shape: f32[1,32], index: 14, kind: input, shape index: {}]   ;;  %s2240_s15 = inlined_call_operand.vmem [shape: bf16[2,8,32], index: 15, kind: output, shape index: {}]  }
   0x1   :  { %s1998_s18 = smov 0  }
   0x2 LB: > { %s37_s19 = sadd.s32 1, %s1899_s1  ;;  %p1710_p0 = scmp.ge.s32.totalorder %s1903_s18, 1  ;;  %s1903_s18 = sphi %s1998_s18, %s25_s18   ;;  %s1899_s1 = sphi %s1996_s1, %s2242_s1   ;;  %s1895_s17 = sphi %s1994_s17, %s2241_s17  }
   0x3   : > { %p39_p1 = scmp.ge.s32.totalorder %s37_s19, 2  ;;  %p472_p2 = scmp.lt.s32.totalorder %s1903_s18, 3 }
   0x5   : > { %s2244_s19 = smov (%p39_p1, %s37_s19), 0  ;;  %p473_p3 = pnand %p1710_p0, %p472_p2 }
   0x6   : > { %v1860_v0 = vld [vmem:[%s2228_s3] sm:$0xff] (!%p473_p3)   ;;  %v1905_v1 = vmov (!%p473_p3), 0.0   ;;  %v1861_v2 = vld [vmem:[%s2228_s3 + $0x8] sm:$0xff] (!%p473_p3)   ;;  %vm1906_vm0 = vmmov (!%p473_p3), 0   ;;  %p531_p4 = scmp.lt.s32.totalorder (!%p473_p3), %s1895_s17, 1  ;;  %vm583_vm1 = vcmask (!%p473_p3), 261120   ;;  %v635_v13 = vlaneseq (!%p473_p3) }
   0x7   : > { %476 = sbr.rel (%p473_p3) target bundleno = 2664 (0xa68), region = 80  ;;  %1769 = vmatprep.subr.bf16.mxu0 (!%p473_p3), %v1905_v1  ;;  %1777 = vmatprep.subr.bf16.mxu1 (!%p473_p3), %v1905_v1  ;;  %v1713_v4 = vld [vmem:[%s2229_s4] ss:$0 sm:$0xff] (!%p473_p3)  ;;  %s1907_s30 = smov (!%p473_p3), 120   ;;  %v1909_v11 = vmov (!%p473_p3), 1983009808  }
   0x8   : > { %1770 = vmatpush3.bf16.msra.mxu0 (!%p473_p3), %v1860_v0  ;;  %1773 = vmatprep.mubr.msk.bf16.mxu0 (!%p473_p3), %vm1906_vm0, %v1905_v1  ;;  %s1908_s16 = smov (!%p473_p3), 112   ;;  %v633_v12 = vunpack.c.l.s4 (!%p473_p3), %v1909_v11  ;;  %v2050_v15 = vshrl.u32 (!%p473_p3), %v635_v13, 7  ;;  %v1910_v19 = vmov (!%p473_p3), 1934713408   ;;  %vm997_vm2 = vcmask (!%p473_p3), 64512   ;;  %s1912_s23 = smov (!%p473_p3), 96  }
   0x9   : > { %1771 = vmatprep.subr.bf16.mxu0 (!%p473_p3), %v1905_v1  ;;  %1779 = vmatprep.mubr.msk.bf16.mxu1 (!%p473_p3), %vm1906_vm0, %v1905_v1  ;;  %v664_v20 = vunpack.c.l.s4 (!%p473_p3), %v1910_v19  ;;  %vm1128_vm5 = vcmask (!%p473_p3), 1043456   ;;  %vm1352_vm6 = vcmask (!%p473_p3), 130048   ;;  %vm1536_vm7 = vcmask (!%p473_p3), 523264  }
   0xa   : > { %v634_v14 = vunpack.c.0.s8 (!%p473_p3), %v633_v12  ;;  %vm1609_vm8 = vcmask (!%p473_p3), 257024  }
   0xb   : > { %v665_v22 = vunpack.c.0.s8 (!%p473_p3), %v664_v20 }
   0xc   : > { %1772 = vmatpush3.bf16.msra.mxu0 (!%p473_p3), %v1861_v2  ;;  %v2057_v18 = vsub.s32 (!%p473_p3), %v634_v14, %v2050_v15 }
   0xd   : > { %1783 = vmatprep.subr.bf16.mxu0 (!%p473_p3), %v1905_v1  ;;  %v2067_v30 = vsub.s32 (!%p473_p3), %v665_v22, %v2050_v15 }
   0xe   : > { %s2246_s17 = smov (!%p531_p4, %s1895_s17), 1 }
   0xf   : > { %s1711_s24 = sshll.u32 %s2246_s17, 2  ;;  %s544_s22 = scalar_lea.vmem %s2227_s2, %s2246_s17 }
  0x10   : > { %s537_s27 = scalar_lea.vmem %s2225_s0, %s1711_s24 }
  0x11   : > { %v2034_v3 = vld [vmem:[%s537_s27] sm:$0xf]  ;;  %s1913_s27 = smov 8  }
  0x12   : > { %1774 = vmatmul.mubr.msk.bf16.vlgmr.msra.gmra.mrb[0].mxu0 %vm583_vm1, %v2034_v3 }
  0x13   : > { %1785 = vmatprep.mubr.msk.bf16.mxu0 %vm1906_vm0, %v1905_v1 }
  0xe5   : > { %v621_v5 = vpop.f32.mrb[0].mxu0 }
  0xe6   : > { %v2043_v6 = vadd.f32 %v1713_v4, %v621_v5  ;;  %v1775_v7 = vpop.f32.mrb[1].mxu0 }
  0xe7   : > { %v624_v8 = vpop.f32.mrb[2].mxu0 }
  0xe8   : > { %628 = vrot.lane.b32.xlu0 %v2043_v6, %s1907_s30  ;;  %v1776_v9 = vpop.f32.mrb[3].mxu0  ;;  %v631_v17 = vcombine.high %v2043_v6, %v1905_v1  ;;  %v638_v26 = vrot.slane %v2043_v6, %v2057_v18 }
  0xea   : > { %v645_v23 = vrot.slane %v631_v17, %v2057_v18 }
  0xec   : > { %749 = vrot.lane.b32.xlu0 %v2043_v6, %s1908_s16 }
 0x15a   : > { %v2047_v10 = vpop.permute.xlu0 %628 }
 0x15b   : > { %751 = vrot.lane.b32.xlu1 %v2047_v10, %s1908_s16  ;;  %v646_v16 = vcombine.high %v2047_v10, %v1905_v1  ;;  %v653_v24 = vrot.slane %v2047_v10, %v2057_v18 }
 0x15d   : > { %v660_v21 = vrot.slane %v646_v16, %v2057_v18  ;;  %v661_v31 = vcombine.low %v638_v26, %v653_v24  ;;  %v662_v32 = vcombine.high %v638_v26, %v653_v24 }
 0x15e   : > { %v750_v25 = vpop.permute.xlu0 %749 }
 0x15f   : > { %v677_v27 = vcombine.low %v645_v23, %v660_v21  ;;  %v678_v28 = vcombine.high %v645_v23, %v660_v21  ;;  %v755_v29 = vcombine.high %v750_v25, %v1905_v1  ;;  %v762_v34 = vrot.slane %v750_v25, %v2057_v18 }
 0x160   : > { %v669_v43 = vrot.slane %v661_v31, %v2067_v30  ;;  %v676_v44 = vrot.slane %v662_v32, %v2067_v30 }
 0x161   : > { %v685_v37 = vrot.slane %v677_v27, %v2067_v30  ;;  %v692_v38 = vrot.slane %v678_v28, %v2067_v30  ;;  %v769_v39 = vrot.slane %v755_v29, %v2057_v18  ;;  %v554_v27 = vld [vmem:[%s544_s22] sm:$0x1]  ;;  %v1096_v28 = vsub.s32 0, %v2050_v15  ;;  %s551_s22 = scalar_lea.vmem %s2240_s15, %s1711_s24 }
 0x162   : > { %v697_v55 = vcombine.low %v669_v43, %v676_v44  ;;  %v1717_v56 = vcombine.high %v669_v43, %v676_v44  ;;  %vm1092_vm3 = vcmp.gt.f32.partialorder %v554_v27, 0.5  ;;  %v1911_v29 = vmov 0  }
 0x163   : > { %v713_v49 = vcombine.low %v685_v37, %v692_v38  ;;  %v1718_v50 = vcombine.high %v685_v37, %v692_v38  ;;  %v1093_v31 = vsel %vm1092_vm3, 1, %v1911_v29 }
 0x164   : > { %v704_v4 = vrot.slane %v697_v55, %v2057_v18  ;;  %v712_v5 = vrot.slane %v1717_v56, %v2057_v18  ;;  %v1097_v32 = vrot.slane %v1093_v31, %v1096_v28 }
 0x165   : > { %v720_v61 = vrot.slane %v713_v49, %v2057_v18  ;;  %v728_v2 = vrot.slane %v1718_v50, %v2057_v18 }
 0x166   : > { %v729_v14 = vcombine.low %v704_v4, %v712_v5  ;;  %vm1098_vm4 = vcmp.eq.s32.totalorder %v1097_v32, 1 }
 0x167   : > { %v737_v11 = vcombine.low %v720_v61, %v728_v2 }
 0x168   : > { %v736_v22 = vrot.slane %v729_v14, %v2067_v30 }
 0x169   : > { %v744_v19 = vrot.slane %v737_v11, %v2067_v30 }
 0x16b   : > { %v745_v23 = vcombine.low %v736_v22, %v744_v19  ;;  %v746_v24 = vcombine.high %v736_v22, %v744_v19 }
 0x16d   : > { %v747_v25 = vpack.c.bf16 %v745_v23, %v745_v23  ;;  %v748_v26 = vpack.c.bf16 %v746_v24, %v746_v24 }
 0x1cd   : > { %v752_v33 = vpop.permute.xlu1 %751 }
 0x1ce   : > { %v770_v35 = vcombine.high %v752_v33, %v1905_v1  ;;  %v777_v36 = vrot.slane %v752_v33, %v2057_v18 }
 0x1d0   : > { %v784_v40 = vrot.slane %v770_v35, %v2057_v18  ;;  %v785_v41 = vcombine.low %v762_v34, %v777_v36  ;;  %v786_v42 = vcombine.high %v762_v34, %v777_v36 }
 0x1d2   : > { %v793_v45 = vrot.slane %v785_v41, %v2067_v30  ;;  %v800_v46 = vrot.slane %v786_v42, %v2067_v30  ;;  %v801_v47 = vcombine.low %v769_v39, %v784_v40  ;;  %v802_v48 = vcombine.high %v769_v39, %v784_v40 }
 0x1d4   : > { %v809_v51 = vrot.slane %v801_v47, %v2067_v30  ;;  %v816_v52 = vrot.slane %v802_v48, %v2067_v30  ;;  %v821_v53 = vcombine.low %v793_v45, %v800_v46  ;;  %v1719_v54 = vcombine.high %v793_v45, %v800_v46 }
 0x1d6   : > { %v837_v57 = vcombine.low %v809_v51, %v816_v52  ;;  %v1720_v58 = vcombine.high %v809_v51, %v816_v52  ;;  %v828_v59 = vrot.slane %v821_v53, %v2057_v18  ;;  %v836_v60 = vrot.slane %v1719_v54, %v2057_v18 }
 0x1d8   : > { %v844_v62 = vrot.slane %v837_v57, %v2057_v18  ;;  %v852_v63 = vrot.slane %v1720_v58, %v2057_v18  ;;  %v853_v0 = vcombine.low %v828_v59, %v836_v60 }
 0x1da   : > { %v861_v7 = vcombine.low %v844_v62, %v852_v63  ;;  %v860_v8 = vrot.slane %v853_v0, %v2067_v30 }
 0x1dc   : > { %v868_v9 = vrot.slane %v861_v7, %v2067_v30 }
 0x1de   : > { %v869_v12 = vcombine.low %v860_v8, %v868_v9  ;;  %v870_v13 = vcombine.high %v860_v8, %v868_v9 }
 0x1e0   : > { %v871_v16 = vpack.c.bf16 %v869_v12, %v869_v12  ;;  %v872_v17 = vpack.c.bf16 %v870_v13, %v870_v13 }
 0x1e2   : > { %v1002_v20 = vsel %vm997_vm2, %v871_v16, 0  ;;  %v1048_v21 = vsel %vm997_vm2, %v872_v17, 0 }
 0x1e3   : > { %1778 = vmatpush3.bf16.xpose.msra.mxu1 %v1002_v20  ;;  %1784 = vmatpush3.bf16.xpose.msra.mxu0 %v1048_v21 }
 0x1e4   : > { %1789 = vmatprep.subr.bf16.mxu1 %v1905_v1  ;;  %1795 = vmatprep.subr.bf16.mxu0 %v1905_v1 }
 0x1ea   : > { %1780 = vmatmul.mubr.msk.bf16.vlgmr.msra.gmra.mrb[0].mxu1 %vm997_vm2, %v747_v25  ;;  %1786 = vmatmul.mubr.msk.bf16.vlgmr.msra.gmra.mrb[4].mxu0 %vm997_vm2, %v748_v26 }
 0x1eb   : > { %1791 = vmatprep.mubr.msk.bf16.mxu1 %vm1906_vm0, %v1905_v1  ;;  %1797 = vmatprep.mubr.msk.bf16.mxu0 %vm1906_vm0, %v1905_v1 }
 0x2bd   : > { %v1038_v33 = vpop.f32.mrb[0].mxu1  ;;  %v1084_v34 = vpop.f32.mrb[4].mxu0 }
 0x2be   : > { %v1090_v35 = vmul.f32 0.35355338, %v1038_v33  ;;  %v1091_v36 = vmul.f32 0.35355338, %v1084_v34  ;;  %v1781_v37 = vpop.f32.mrb[1].mxu1  ;;  %v1787_v38 = vpop.f32.mrb[5].mxu0 }
 0x2bf   : > { %v1041_v39 = vpop.f32.mrb[2].mxu1  ;;  %v1087_v40 = vpop.f32.mrb[6].mxu0 }
 0x2c0   : > { %v1782_v41 = vpop.f32.mrb[3].mxu1  ;;  %v1788_v42 = vpop.f32.mrb[7].mxu0  ;;  %v1099_v43 = vsel %vm1098_vm4, -1e+09, %v1090_v35  ;;  %v1100_v44 = vsel %vm1098_vm4, -1e+09, %v1091_v36 }
 0x2c1   : > { %v1101_v45 = vsel %vm997_vm2, %v1099_v43, -inf  ;;  %v1104_v15 = vsel %vm997_vm2, %v1100_v44, -inf }
 0x2c2   : > { %1102 = vmax.xlane.f32.xlu1 %v1101_v45  ;;  %1105 = vmax.xlane.f32.xlu0 %v1104_v15 }
 0x34f   : > { %v1103_v46 = vpop.xlane.xlu1 %1102  ;;  %v1106_v47 = vpop.xlane.xlu0 %1105 }
 0x350   : > { %v1107_v48 = vsub.f32 %v1099_v43, %v1103_v46  ;;  %v1108_v49 = vsub.f32 %v1100_v44, %v1106_v47 }
 0x352   : > { %v1109_v50 = vmul.f32 1.442695, %v1107_v48  ;;  %v1111_v51 = vmul.f32 1.442695, %v1108_v49 }
 0x354   : > { %1869 = vpow2.f32 %v1109_v50 }
 0x355   : > { %1871 = vpow2.f32 %v1111_v51 }
 0x35e   : > { %v1870_v52 = vpop.eup %1869 }
 0x35f   : > { %v1872_v53 = vpop.eup %1871  ;;  %v1113_v54 = vsel %vm997_vm2, %v1870_v52, 0.0 }
 0x360   : > { %1114 = vadd.xlane.f32.xlu0 %v1113_v54  ;;  %v1116_v55 = vsel %vm997_vm2, %v1872_v53, 0.0 }
 0x361   : > { %1117 = vadd.xlane.f32.xlu1 %v1116_v55 }
 0x372   : > { %875 = vrot.lane.b32.xlu1 %v2047_v10, %s1912_s23 }
 0x376   : > { %873 = vrot.lane.b32.xlu0 %v2043_v6, %s1912_s23 }
 0x3ed   : > { %v1115_v56 = vpop.xlane.xlu0 %1114 }
 0x3ee   : > { %v1118_v57 = vpop.xlane.xlu1 %1117  ;;  %1873 = vrcp.f32 %v1115_v56 }
 0x3ef   : > { %1875 = vrcp.f32 %v1118_v57 }
 0x3f1   : > { %v874_v58 = vpop.permute.xlu0 %873 }
 0x3f2   : > { %v876_v59 = vpop.permute.xlu1 %875  ;;  %v879_v60 = vcombine.high %v874_v58, %v1905_v1  ;;  %v886_v61 = vrot.slane %v874_v58, %v2057_v18  ;;  %v1862_v58 = vld [vmem:[%s2230_s5] sm:$0xff]  }
 0x3f3   : > { %v894_v62 = vcombine.high %v876_v59, %v1905_v1  ;;  %v901_v63 = vrot.slane %v876_v59, %v2057_v18 }
 0x3f4   : > { %v893_v0 = vrot.slane %v879_v60, %v2057_v18 }
 0x3f5   : > { %v908_v2 = vrot.slane %v894_v62, %v2057_v18  ;;  %v909_v4 = vcombine.low %v886_v61, %v901_v63  ;;  %v910_v10 = vcombine.high %v886_v61, %v901_v63 }
 0x3f7   : > { %v917_v6 = vrot.slane %v909_v4, %v2067_v30  ;;  %v924_v5 = vrot.slane %v910_v10, %v2067_v30  ;;  %v925_v7 = vcombine.low %v893_v0, %v908_v2  ;;  %v926_v8 = vcombine.high %v893_v0, %v908_v2 }
 0x3f8   : > { %v1874_v24 = vpop.eup %1873 }
 0x3f9   : > { %v933_v9 = vrot.slane %v925_v7, %v2067_v30  ;;  %v940_v11 = vrot.slane %v926_v8, %v2067_v30  ;;  %v945_v12 = vcombine.low %v917_v6, %v924_v5  ;;  %v1721_v13 = vcombine.high %v917_v6, %v924_v5  ;;  %v1876_v27 = vpop.eup %1875 }
 0x3fa   : > { %v1122_v31 = vmul.f32 %v1876_v27, %v1872_v53  ;;  %v1121_v32 = vmul.f32 %v1874_v24, %v1870_v52 }
 0x3fb   : > { %v952_v14 = vrot.slane %v945_v12, %v2057_v18  ;;  %v961_v16 = vcombine.low %v933_v9, %v940_v11  ;;  %v1722_v17 = vcombine.high %v933_v9, %v940_v11  ;;  %v960_v19 = vrot.slane %v1721_v13, %v2057_v18 }
 0x3fc   : > { %v1123_v37 = vpack.c.bf16 %v1121_v32, %v1121_v32  ;;  %v1124_v38 = vpack.c.bf16 %v1122_v31, %v1122_v31  ;;  %v1864_v31 = vld [vmem:[%s2234_s9 + $0x8] sm:$0xff]   ;;  %v1865_v32 = vld [vmem:[%s2236_s11] sm:$0xff]  }
 0x3fd   : > { %v968_v20 = vrot.slane %v961_v16, %v2057_v18  ;;  %v976_v21 = vrot.slane %v1722_v17, %v2057_v18  ;;  %v977_v22 = vcombine.low %v952_v14, %v960_v19  ;;  %v1396_v17 = vunpack.c.l.bf16 %v2034_v3  ;;  %v1863_v3 = vld [vmem:[%s2234_s9] sm:$0xff]  }
 0x3ff   : > { %v985_v23 = vcombine.low %v968_v20, %v976_v21  ;;  %v984_v25 = vrot.slane %v977_v22, %v2067_v30 }
 0x401   : > { %v992_v26 = vrot.slane %v985_v23, %v2067_v30 }
 0x403   : > { %v993_v28 = vcombine.low %v984_v25, %v992_v26  ;;  %v994_v29 = vcombine.high %v984_v25, %v992_v26 }
 0x405   : > { %v995_v33 = vpack.c.bf16 %v993_v28, %v993_v28  ;;  %v996_v34 = vpack.c.bf16 %v994_v29, %v994_v29 }
 0x407   : > { %v1130_v35 = vsel %vm1128_vm5, %v995_v33, 0  ;;  %v1176_v36 = vsel %vm1128_vm5, %v996_v34, 0  ;;  %v1866_v33 = vld [vmem:[%s2236_s11 + $0x8] sm:$0xff]  }
 0x408   : > { %1790 = vmatpush3.bf16.msra.mxu1 %v1130_v35  ;;  %1796 = vmatpush3.bf16.msra.mxu0 %v1176_v36 }
 0x409   : > { %1801 = vmatprep.subr.bf16.mxu1 %v1905_v1  ;;  %1807 = vmatprep.subr.bf16.mxu0 %v1905_v1 }
 0x40b   : > { %1792 = vmatmul.mubr.msk.bf16.vlgmr.msra.gmra.mrb[4].mxu1 %vm997_vm2, %v1123_v37  ;;  %1798 = vmatmul.mubr.msk.bf16.vlgmr.msra.gmra.mrb[8].mxu0 %vm997_vm2, %v1124_v38  ;;  %v1732_v38 = vld [vmem:[%s2232_s7] ss:$0 sm:$0xff] }
 0x40c   : > { %1803 = vmatprep.mubr.msk.bf16.mxu1 %vm1906_vm0, %v1905_v1  ;;  %1811 = vmatprep.mubr.msk.bf16.mxu0 %vm1906_vm0, %v1905_v1 }
 0x40d   : > { %1802 = vmatpush3.bf16.msra.mxu1 %v1862_v58  ;;  %1808 = vmatpush3.bf16.msra.mxu0 %v1863_v3 }
 0x40e   : > { %1815 = vmatprep.subr.bf16.mxu1 %v1905_v1  ;;  %1809 = vmatprep.subr.bf16.mxu0 %v1905_v1 }
 0x411   : > { %1810 = vmatpush3.bf16.msra.mxu0 %v1864_v31 }
 0x4de   : > { %v1166_v39 = vpop.f32.mrb[4].mxu1  ;;  %v1212_v40 = vpop.f32.mrb[8].mxu0 }
 0x4df   : > { %v1218_v41 = vcombine.high %v1166_v39, %v1905_v1  ;;  %v1225_v42 = vrot.slane %v1166_v39, %v2057_v18  ;;  %v1233_v43 = vcombine.high %v1212_v40, %v1905_v1  ;;  %v1240_v44 = vrot.slane %v1212_v40, %v2057_v18  ;;  %v1793_v45 = vpop.f32.mrb[5].mxu1  ;;  %v1799_v15 = vpop.f32.mrb[9].mxu0  ;;  %v1733_v40 = vld [vmem:[%s2233_s8] ss:$0 sm:$0xff] }
 0x4e0   : > { %v1169_v46 = vpop.f32.mrb[6].mxu1  ;;  %v1215_v47 = vpop.f32.mrb[10].mxu0  ;;  %v1868_v45 = vld [vmem:[%s2236_s11 + $0x18] sm:$0xff]   ;;  %v1734_v15 = vld [vmem:[%s2235_s10] ss:$0 sm:$0xff] }
 0x4e1   : > { %v1232_v48 = vrot.slane %v1218_v41, %v2057_v18  ;;  %v1247_v49 = vrot.slane %v1233_v43, %v2057_v18  ;;  %v1248_v50 = vcombine.low %v1225_v42, %v1240_v44  ;;  %v1249_v51 = vcombine.high %v1225_v42, %v1240_v44  ;;  %v1794_v52 = vpop.f32.mrb[7].mxu1  ;;  %v1800_v53 = vpop.f32.mrb[11].mxu0  ;;  %v1867_v44 = vld [vmem:[%s2236_s11 + $0x10] sm:$0xff]  }
 0x4e3   : > { %v1256_v54 = vrot.slane %v1248_v50, %v2067_v30  ;;  %v1263_v55 = vrot.slane %v1249_v51, %v2067_v30  ;;  %v1264_v56 = vcombine.low %v1232_v48, %v1247_v49  ;;  %v1265_v57 = vcombine.high %v1232_v48, %v1247_v49 }
 0x4e5   : > { %v1272_v59 = vrot.slane %v1264_v56, %v2067_v30  ;;  %v1279_v60 = vrot.slane %v1265_v57, %v2067_v30  ;;  %v1284_v61 = vcombine.low %v1256_v54, %v1263_v55  ;;  %v1727_v62 = vcombine.high %v1256_v54, %v1263_v55 }
 0x4e7   : > { %v1291_v63 = vrot.slane %v1284_v61, %v2057_v18  ;;  %v1299_v0 = vrot.slane %v1727_v62, %v2057_v18  ;;  %v1300_v2 = vcombine.low %v1272_v59, %v1279_v60  ;;  %v1728_v4 = vcombine.high %v1272_v59, %v1279_v60 }
 0x4e9   : > { %v1307_v10 = vrot.slane %v1300_v2, %v2057_v18  ;;  %v1315_v6 = vrot.slane %v1728_v4, %v2057_v18  ;;  %v1316_v5 = vcombine.low %v1291_v63, %v1299_v0  ;;  %v1729_v18 = vld [vmem:[%s2231_s6] ss:$0 sm:$0xff] }
 0x4eb   : > { %v1324_v7 = vcombine.low %v1307_v10, %v1315_v6  ;;  %v1323_v8 = vrot.slane %v1316_v5, %v2067_v30  ;;  %v1744_v5 = vld [vmem:[%s2238_s13] ss:$0 sm:$0xff] }
 0x4ed   : > { %v1331_v9 = vrot.slane %v1324_v7, %v2067_v30 }
 0x4ef   : > { %v1333_v11 = vcombine.high %v1323_v8, %v1331_v9  ;;  %v1332_v12 = vcombine.low %v1323_v8, %v1331_v9  ;;  %v1745_v8 = vld [vmem:[%s2239_s14] ss:$0 sm:$0xff] }
 0x4f1   : > { %1335 = vrot.lane.b32.xlu1 %v1333_v11, %s1913_s27 }
 0x563   : > { %v1336_v13 = vpop.permute.xlu1 %1335 }
 0x564   : > { %v1338_v14 = vsel %vm997_vm2, %v1332_v12, %v1336_v13 }
 0x565   : > { %v1339_v16 = vpack.c.bf16 %v1338_v14, %v1338_v14 }
 0x567   : > { %1804 = vmatmul.mubr.msk.bf16.vlgmr.msra.gmra.mrb[8].mxu1 %vm1352_vm6, %v1339_v16 }
 0x568   : > { %1823 = vmatprep.mubr.msk.bf16.mxu1 %vm1906_vm0, %v1905_v1  ;;  %1816 = vmatpush3.bf16.msra.mxu1 %v1865_v32 }
 0x569   : > { %1817 = vmatprep.subr.bf16.mxu1 %v1905_v1 }
 0x56c   : > { %1818 = vmatpush3.bf16.msra.mxu1 %v1866_v33 }
 0x56d   : > { %1819 = vmatprep.subr.bf16.mxu1 %v1905_v1 }
 0x570   : > { %1820 = vmatpush3.bf16.msra.mxu1 %v1867_v44 }
 0x571   : > { %1821 = vmatprep.subr.bf16.mxu1 %v1905_v1  ;;  %v1738_v1 = vld [vmem:[%s2237_s12] ss:$0 sm:$0xff] }
 0x574   : > { %1822 = vmatpush3.bf16.msra.mxu1 %v1868_v45 }
 0x63a   : > { %v1390_v30 = vpop.f32.mrb[8].mxu1 }
 0x63b   : > { %v1391_v19 = vadd.f32 %v1729_v18, %v1390_v30  ;;  %v1805_v20 = vpop.f32.mrb[9].mxu1 }
 0x63c   : > { %v1393_v21 = vpop.f32.mrb[10].mxu1 }
 0x63d   : > { %v1806_v22 = vpop.f32.mrb[11].mxu1  ;;  %v1397_v23 = vadd.f32 %v1396_v17, %v1391_v19 }
 0x63f   : > { %v1398_v24 = vsel %vm583_vm1, %v1397_v23, 0.0 }
 0x640   : > { %1399 = vadd.xlane.f32.xlu0 %v1398_v24 }
 0x6cd   : > { %v1400_v25 = vpop.xlane.xlu0 %1399 }
 0x6ce   : > { %v1402_v26 = vmul.f32 0.03125, %v1400_v25 }
 0x6d0   : > { %v1403_v27 = vsub.f32 %v1397_v23, %v1402_v26 }
 0x6d2   : > { %v1404_v28 = vmul.f32 %v1403_v27, %v1403_v27 }
 0x6d4   : > { %v1405_v29 = vsel %vm583_vm1, %v1404_v28, 0.0 }
 0x6d5   : > { %1406 = vadd.xlane.f32.xlu1 %v1405_v29 }
 0x762   : > { %v1407_v34 = vpop.xlane.xlu1 %1406 }
 0x763   : > { %v1408_v35 = vmul.f32 0.03125, %v1407_v34 }
 0x765   : > { %v1409_v36 = vadd.f32 1e-05, %v1408_v35 }
 0x767   : > { %1877 = vrsqrt.f32 %v1409_v36 }
 0x771   : > { %v1878_v37 = vpop.eup %1877 }
 0x772   : > { %v1411_v39 = vmul.f32 %v1878_v37, %v1403_v27 }
 0x774   : > { %v1418_v41 = vmul.f32 %v1732_v38, %v1411_v39 }
 0x776   : > { %v1425_v42 = vadd.f32 %v1733_v40, %v1418_v41 }
 0x778   : > { %v1442_v43 = vpack.c.bf16 %v1425_v42, %v1425_v42 }
 0x77a   : > { %1812 = vmatmul.mubr.msk.bf16.vlgmr.msra.gmra.mrb[12].mxu0 %vm583_vm1, %v1442_v43 }
 0x84d   : > { %v1498_v46 = vpop.f32.mrb[12].mxu0 }
 0x84e   : > { %v1499_v47 = vadd.f32 %v1734_v15, %v1498_v46  ;;  %v1813_v48 = vpop.f32.mrb[13].mxu0 }
 0x84f   : > { %v1501_v49 = vpop.f32.mrb[14].mxu0 }
 0x850   : > { %v1504_v50 = vmax.f32 %v1499_v47, 0.0  ;;  %v1814_v51 = vpop.f32.mrb[15].mxu0 }
 0x852   : > { %v1505_v52 = vpack.c.bf16 %v1504_v50, %v1504_v50 }
 0x854   : > { %1824 = vmatmul.mubr.msk.bf16.vlgmr.msra.gmra.mrb[12].mxu1 %vm1536_vm7, %v1505_v52 }
 0x927   : > { %v1574_v53 = vpop.f32.mrb[12].mxu1 }
 0x928   : > { %v1575_v54 = vadd.f32 %v1738_v1, %v1574_v53  ;;  %v1825_v55 = vpop.f32.mrb[13].mxu1 }
 0x929   : > { %v1577_v56 = vpop.f32.mrb[14].mxu1 }
 0x92a   : > { %v1826_v57 = vpop.f32.mrb[15].mxu1  ;;  %v1580_v58 = vadd.f32 %v1575_v54, %v1425_v42 }
 0x92c   : > { %v1581_v59 = vsel %vm583_vm1, %v1580_v58, 0.0 }
 0x92d   : > { %1582 = vadd.xlane.f32.xlu0 %v1581_v59 }
 0x9ba   : > { %v1583_v60 = vpop.xlane.xlu0 %1582 }
 0x9bb   : > { %v1584_v61 = vmul.f32 0.03125, %v1583_v60 }
 0x9bd   : > { %v1585_v62 = vsub.f32 %v1580_v58, %v1584_v61 }
 0x9bf   : > { %v1586_v63 = vmul.f32 %v1585_v62, %v1585_v62 }
 0x9c1   : > { %v1587_v0 = vsel %vm583_vm1, %v1586_v63, 0.0 }
 0x9c2   : > { %1588 = vadd.xlane.f32.xlu0 %v1587_v0 }
 0xa4f   : > { %v1589_v2 = vpop.xlane.xlu0 %1588 }
 0xa50   : > { %v1590_v4 = vmul.f32 0.03125, %v1589_v2 }
 0xa52   : > { %v1591_v10 = vadd.f32 1e-05, %v1590_v4 }
 0xa54   : > { %1879 = vrsqrt.f32 %v1591_v10 }
 0xa5e   : > { %v1880_v6 = vpop.eup %1879 }
 0xa5f   : > { %v1593_v7 = vmul.f32 %v1880_v6, %v1585_v62 }
 0xa61   : > { %v1600_v9 = vmul.f32 %v1744_v5, %v1593_v7 }
 0xa63   : > { %v1607_v11 = vadd.f32 %v1745_v8, %v1600_v9 }
 0xa65   : > { %v1608_v12 = vpack.c.bf16 %v1607_v11, %v1607_v11 }
 0xa67   : > { %1610 = vst.msk [vmem:[%s551_s22] sm:$0xf] %vm1609_vm8, %v1608_v12 }
 0xa68 PF: > { %s25_s18 = sadd.s32 1, %s1903_s18   ;;  %s2241_s17 = smov %s1899_s1 }
 0xa69   : > { %p22_p5 = scmp.ge.s32.totalorder %s25_s18, 4   ;;  %s2242_s1 = smov %s2244_s19 }
 0xa6b   :  { %24 = sbr.rel (!%p22_p5) target bundleno = 2 (0x2), region = 116 }

// kernel: transformer_forward.7
= control target key start
LH: loop header
LB: loop body
LE: loop exit
PB: predicated region body
PF: predicated region fallthrough
CT: control target
= control target key end

     0   :  { %s3412_s29 = smov 0   ;;  %s3823_s0 = inlined_call_operand.vmem [shape: bf16[2,8,32], index: 0, kind: input, shape index: {}, may-alias: {0,1}]   ;;  %s3824_s1 = inlined_call_operand.vmem [shape: bf16[2,8,32], index: 1, kind: input, shape index: {}, may-alias: {0,1}]   ;;  %s3825_s2 = inlined_call_operand.vmem [shape: bf16[2,8,32], index: 2, kind: input, shape index: {}]   ;;  %s3826_s3 = inlined_call_operand.vmem [shape: f32[2,1,8], index: 3, kind: input, shape index: {}]   ;;  %s3827_s4 = inlined_call_operand.vmem [shape: f32[2,1,8], index: 4, kind: input, shape index: {}]   ;;  %s3828_s5 = inlined_call_operand.vmem [shape: bf16[32,48], index: 5, kind: input, shape index: {}]   ;;  %s3829_s6 = inlined_call_operand.vmem [shape: f32[1,48], index: 6, kind: input, shape index: {}]   ;;  %s3830_s7 = inlined_call_operand.vmem [shape: bf16[16,32], index: 7, kind: input, shape index: {}]   ;;  %s3831_s8 = inlined_call_operand.vmem [shape: f32[1,32], index: 8, kind: input, shape index: {}]   ;;  %s3832_s9 = inlined_call_operand.vmem [shape: f32[1,32], index: 9, kind: input, shape index: {}]   ;;  %s3833_s10 = inlined_call_operand.vmem [shape: f32[1,32], index: 10, kind: input, shape index: {}]   ;;  %s3834_s11 = inlined_call_operand.vmem [shape: bf16[32,16], index: 11, kind: input, shape index: {}]   ;;  %s3835_s12 = inlined_call_operand.vmem [shape: f32[1,16], index: 12, kind: input, shape index: {}]   ;;  %s3836_s13 = inlined_call_operand.vmem [shape: bf16[32,32], index: 13, kind: input, shape index: {}]   ;;  %s3837_s14 = inlined_call_operand.vmem [shape: f32[1,32], index: 14, kind: input, shape index: {}]   ;;  %s3838_s15 = inlined_call_operand.vmem [shape: bf16[16,32], index: 15, kind: input, shape index: {}]   ;;  %s3839_s16 = inlined_call_operand.vmem [shape: f32[1,32], index: 16, kind: input, shape index: {}]   ;;  %s3840_s17 = inlined_call_operand.vmem [shape: f32[1,32], index: 17, kind: input, shape index: {}]   ;;  %s3841_s18 = inlined_call_operand.vmem [shape: f32[1,32], index: 18, kind: input, shape index: {}]   ;;  %s3842_s19 = inlined_call_operand.vmem [shape: bf16[32,64], index: 19, kind: input, shape index: {}]   ;;  %s3843_s20 = inlined_call_operand.vmem [shape: f32[1,64], index: 20, kind: input, shape index: {}]   ;;  %s3844_s21 = inlined_call_operand.vmem [shape: bf16[64,32], index: 21, kind: input, shape index: {}]   ;;  %s3845_s22 = inlined_call_operand.vmem [shape: f32[1,32], index: 22, kind: input, shape index: {}]   ;;  %s3846_s23 = inlined_call_operand.vmem [shape: f32[1,32], index: 23, kind: input, shape index: {}]   ;;  %s3847_s24 = inlined_call_operand.vmem [shape: f32[1,32], index: 24, kind: input, shape index: {}]   ;;  %s3848_s25 = inlined_call_operand.vmem [shape: bf16[2,8,32], index: 25, kind: output, shape index: {}]  }
   0x1   :  { %3853 = sst [smem:[#allocation2_spill]] %s3823_s0 }
   0x2   :  { %3854 = sst [smem:[#allocation3_spill]] %s3825_s2  ;;  %s3414_s2 = smov 0  }
   0x3   :  { %3855 = sst [smem:[#allocation4_spill]] %s3826_s3 }
   0x4   :  { %3856 = sst [smem:[#allocation5_spill]] %s3827_s4 }
   0x5   :  { %3857 = sst [smem:[#allocation6_spill]] %s3828_s5 }
   0x6   :  { %3858 = sst [smem:[#allocation7_spill]] %s3829_s6  ;;  %s3416_s6 = smov 0  }
   0x7   :  { %3859 = sst [smem:[#allocation8_spill]] %s3830_s7 }
   0x8   :  { %3860 = sst [smem:[#allocation9_spill]] %s3831_s8 }
   0x9   :  { %3861 = sst [smem:[#allocation10_spill]] %s3832_s9 }
   0xa LB: > { %s47_s30 = sadd.s32 1, %s3267_s2  ;;  %p2975_p0 = scmp.ge.s32.totalorder %s3271_s6, 1  ;;  %s3271_s6 = sphi %s3416_s6, %s35_s6   ;;  %s3267_s2 = sphi %s3414_s2, %s3874_s2   ;;  %s3263_s29 = sphi %s3412_s29, %s3873_s29  }
   0xb   : > { %p49_p1 = scmp.ge.s32.totalorder %s47_s30, 2  ;;  %p739_p2 = scmp.lt.s32.totalorder %s3271_s6, 3 }
   0xd   : > { %s3876_s30 = smov (%p49_p1, %s47_s30), 0  ;;  %p740_p3 = pnand %p2975_p0, %p739_p2 }
   0xe   : > { %s3862_s26 = sld [smem:[#allocation6_spill]] (!%p740_p3)  ;;  %v3273_v1 = vmov (!%p740_p3), 0.0   ;;  %vm3274_vm0 = vmmov (!%p740_p3), 0   ;;  %p825_p4 = scmp.lt.s32.totalorder (!%p740_p3), %s3263_s29, 1  ;;  %vm887_vm1 = vcmask (!%p740_p3), 261120   ;;  %v939_v13 = vlaneseq (!%p740_p3) }
   0xf   : > { %743 = sbr.rel (%p740_p3) target bundleno = 4450 (0x1162), region = 120  ;;  %3076 = vmatprep.subr.bf16.mxu1 (!%p740_p3), %v3273_v1  ;;  %3090 = vmatprep.subr.bf16.mxu0 (!%p740_p3), %v3273_v1  ;;  %s3863_s9 = sld [smem:[#allocation2_spill]] (!%p740_p3)  ;;  %v3277_v11 = vmov (!%p740_p3), 1983009808   ;;  %v3278_v19 = vmov (!%p740_p3), 1934713408  }
  0x10   : > { %3080 = vmatprep.mubr.msk.bf16.mxu1 (!%p740_p3), %vm3274_vm0, %v3273_v1  ;;  %3092 = vmatprep.mubr.msk.bf16.mxu0 (!%p740_p3), %vm3274_vm0, %v3273_v1  ;;  %s3864_s3 = sld [smem:[#allocation7_spill]] (!%p740_p3)  ;;  %s3275_s1 = smov (!%p740_p3), 120   ;;  %v937_v12 = vunpack.c.l.s4 (!%p740_p3), %v3277_v11  ;;  %v3473_v15 = vshrl.u32 (!%p740_p3), %v939_v13, 7  ;;  %v968_v20 = vunpack.c.l.s4 (!%p740_p3), %v3278_v19  ;;  %vm1301_vm2 = vcmask (!%p740_p3), 64512  }
  0x11   : > { %s3851_s8 = smov (!%p740_p3), 112   ;;  %s3280_s0 = smov (!%p740_p3), 96   ;;  %vm1442_vm7 = vcmask (!%p740_p3), 1043456   ;;  %vm1666_vm8 = vcmask (!%p740_p3), 130048   ;;  %vm2780_vm11 = vcmask (!%p740_p3), 523264   ;;  %vm2853_vm12 = vcmask (!%p740_p3), 257024  }
  0x12   : > { %v938_v14 = vunpack.c.0.s8 (!%p740_p3), %v937_v12  ;;  %v969_v22 = vunpack.c.0.s8 (!%p740_p3), %v968_v20  ;;  %s3866_s4 = sld [smem:[#allocation8_spill]] (!%p740_p3)  ;;  %s3850_s28 = smov (!%p740_p3), 8  }
  0x14   : > { %v3213_v0 = vld [vmem:[%s3862_s26] sm:$0xff] (!%p740_p3)   ;;  %v3214_v2 = vld [vmem:[%s3862_s26 + $0x8] sm:$0xff] (!%p740_p3)   ;;  %v3480_v18 = vsub.s32 (!%p740_p3), %v938_v14, %v3473_v15  ;;  %v3490_v30 = vsub.s32 (!%p740_p3), %v969_v22, %v3473_v15 }
  0x15   : > { %3077 = vmatpush3.bf16.msra.mxu1 (!%p740_p3), %v3213_v0 }
  0x16   : > { %3078 = vmatprep.subr.bf16.mxu1 %v3273_v1  ;;  %s3878_s29 = smov (!%p825_p4, %s3263_s29), 1  ;;  %v2979_v4 = vld [vmem:[%s3864_s3] ss:$0 sm:$0xff] }
  0x17   : > { %s3446_s27 = sshll.u32 %s3878_s29, 2 }
  0x18   : > { %s831_s5 = scalar_lea.vmem %s3863_s9, %s3446_s27  ;;  %s3865_s9 = sld [smem:[#allocation4_spill]] }
  0x19   : > { %3079 = vmatpush3.bf16.msra.mxu1 %v3214_v2  ;;  %v3453_v3 = vld [vmem:[%s831_s5] sm:$0xf]  ;;  %s852_s7 = scalar_lea.vmem %s3848_s25, %s3446_s27 }
  0x1a   : > { %3084 = vmatprep.subr.bf16.mxu1 %v3273_v1 }
  0x1c   : > { %3081 = vmatmul.mubr.msk.bf16.vlgmr.msra.gmra.mrb[0].mxu1 %vm887_vm1, %v3453_v3 }
  0x1d   : > { %3086 = vmatprep.mubr.msk.bf16.mxu1 %vm3274_vm0, %v3273_v1 }
  0x1e   : > { %s842_s5 = scalar_lea.vmem %s3865_s9, %s3878_s29 }
  0xef   : > { %v925_v5 = vpop.f32.mrb[0].mxu1 }
  0xf0   : > { %v3462_v6 = vadd.f32 %v2979_v4, %v925_v5  ;;  %v3082_v7 = vpop.f32.mrb[1].mxu1 }
  0xf1   : > { %v928_v8 = vpop.f32.mrb[2].mxu1 }
  0xf2   : > { %932 = vrot.lane.b32.xlu0 %v3462_v6, %s3275_s1  ;;  %v3083_v9 = vpop.f32.mrb[3].mxu1  ;;  %v935_v17 = vcombine.high %v3462_v6, %v3273_v1  ;;  %v942_v26 = vrot.slane %v3462_v6, %v3480_v18 }
  0xf4   : > { %v949_v23 = vrot.slane %v935_v17, %v3480_v18 }
  0xf6   : > { %1053 = vrot.lane.b32.xlu0 %v3462_v6, %s3851_s8 }
 0x164   : > { %v3468_v10 = vpop.permute.xlu0 %932 }
 0x165   : > { %1055 = vrot.lane.b32.xlu1 %v3468_v10, %s3851_s8  ;;  %v950_v16 = vcombine.high %v3468_v10, %v3273_v1  ;;  %v957_v24 = vrot.slane %v3468_v10, %v3480_v18 }
 0x167   : > { %v964_v21 = vrot.slane %v950_v16, %v3480_v18  ;;  %v965_v31 = vcombine.low %v942_v26, %v957_v24  ;;  %v966_v32 = vcombine.high %v942_v26, %v957_v24 }
 0x168   : > { %v1054_v25 = vpop.permute.xlu0 %1053 }
 0x169   : > { %v981_v27 = vcombine.low %v949_v23, %v964_v21  ;;  %v982_v28 = vcombine.high %v949_v23, %v964_v21  ;;  %v1059_v29 = vcombine.high %v1054_v25, %v3273_v1  ;;  %v1066_v34 = vrot.slane %v1054_v25, %v3480_v18 }
 0x16a   : > { %v973_v43 = vrot.slane %v965_v31, %v3490_v30  ;;  %v980_v44 = vrot.slane %v966_v32, %v3490_v30  ;;  %v3279_v31 = vmov 0  }
 0x16b   : > { %v989_v37 = vrot.slane %v981_v27, %v3490_v30  ;;  %v996_v38 = vrot.slane %v982_v28, %v3490_v30  ;;  %v1073_v39 = vrot.slane %v1059_v29, %v3480_v18  ;;  %v856_v28 = vld [vmem:[%s842_s5] sm:$0x1]  ;;  %v1407_v29 = vsub.s32 0, %v3473_v15  ;;  %s3870_s5 = sld [smem:[#allocation5_spill]] }
 0x16c   : > { %v1001_v55 = vcombine.low %v973_v43, %v980_v44  ;;  %v2983_v56 = vcombine.high %v973_v43, %v980_v44  ;;  %vm1396_vm3 = vcmp.gt.f32.partialorder %v856_v28, 0.5 }
 0x16d   : > { %v1017_v49 = vcombine.low %v989_v37, %v996_v38  ;;  %v2984_v50 = vcombine.high %v989_v37, %v996_v38  ;;  %v1404_v32 = vsel %vm1396_vm3, 1, %v3279_v31 }
 0x16e   : > { %v1008_v4 = vrot.slane %v1001_v55, %v3480_v18  ;;  %v1016_v5 = vrot.slane %v2983_v56, %v3480_v18 }
 0x16f   : > { %v1024_v61 = vrot.slane %v1017_v49, %v3480_v18  ;;  %v1032_v62 = vrot.slane %v2984_v50, %v3480_v18 }
 0x170   : > { %v1033_v12 = vcombine.low %v1008_v4, %v1016_v5 }
 0x171   : > { %v1041_v11 = vcombine.low %v1024_v61, %v1032_v62 }
 0x172   : > { %v1040_v23 = vrot.slane %v1033_v12, %v3490_v30 }
 0x173   : > { %v1048_v20 = vrot.slane %v1041_v11, %v3490_v30 }
 0x175   : > { %v1049_v24 = vcombine.low %v1040_v23, %v1048_v20  ;;  %v1050_v25 = vcombine.high %v1040_v23, %v1048_v20 }
 0x177   : > { %v1051_v26 = vpack.c.bf16 %v1049_v24, %v1049_v24  ;;  %v1052_v27 = vpack.c.bf16 %v1050_v25, %v1050_v25 }
 0x1d7   : > { %v1056_v33 = vpop.permute.xlu1 %1055 }
 0x1d8   : > { %v1074_v35 = vcombine.high %v1056_v33, %v3273_v1  ;;  %v1081_v36 = vrot.slane %v1056_v33, %v3480_v18  ;;  %v1402_v33 = vand.u32 127, %v939_v13 }
 0x1da   : > { %v1088_v40 = vrot.slane %v1074_v35, %v3480_v18  ;;  %v1089_v41 = vcombine.low %v1066_v34, %v1081_v36  ;;  %v1090_v42 = vcombine.high %v1066_v34, %v1081_v36  ;;  %v1408_v34 = vrot.slane %v1404_v32, %v1407_v29 }
 0x1db   : > { %vm1403_vm4 = vcmp.gt.s32.totalorder %v1402_v33, %v3473_v15 }
 0x1dc   : > { %v1097_v45 = vrot.slane %v1089_v41, %v3490_v30  ;;  %v1104_v46 = vrot.slane %v1090_v42, %v3490_v30  ;;  %v1105_v47 = vcombine.low %v1073_v39, %v1088_v40  ;;  %v1106_v48 = vcombine.high %v1073_v39, %v1088_v40 }
 0x1dd   : > { %vm1409_vm5 = vcmp.eq.s32.totalorder %v1408_v34, 1 }
 0x1de   : > { %v1113_v51 = vrot.slane %v1105_v47, %v3490_v30  ;;  %v1120_v52 = vrot.slane %v1106_v48, %v3490_v30  ;;  %v1125_v53 = vcombine.low %v1097_v45, %v1104_v46  ;;  %v2985_v54 = vcombine.high %v1097_v45, %v1104_v46  ;;  %vm1410_vm6 = vmor %vm1409_vm5, %vm1403_vm4 }
 0x1e0   : > { %v1132_v57 = vrot.slane %v1125_v53, %v3480_v18  ;;  %v1140_v58 = vrot.slane %v2985_v54, %v3480_v18  ;;  %v1141_v59 = vcombine.low %v1113_v51, %v1120_v52  ;;  %v2986_v60 = vcombine.high %v1113_v51, %v1120_v52 }
 0x1e2   : > { %v1148_v63 = vrot.slane %v1141_v59, %v3480_v18  ;;  %v1156_v0 = vrot.slane %v2986_v60, %v3480_v18  ;;  %v1157_v2 = vcombine.low %v1132_v57, %v1140_v58 }
 0x1e4   : > { %v1165_v7 = vcombine.low %v1148_v63, %v1156_v0  ;;  %v1164_v8 = vrot.slane %v1157_v2, %v3490_v30 }
 0x1e6   : > { %v1172_v9 = vrot.slane %v1165_v7, %v3490_v30 }
 0x1e8   : > { %v1173_v14 = vcombine.low %v1164_v8, %v1172_v9  ;;  %v1174_v16 = vcombine.high %v1164_v8, %v1172_v9 }
 0x1ea   : > { %v1175_v17 = vpack.c.bf16 %v1173_v14, %v1173_v14  ;;  %v1176_v19 = vpack.c.bf16 %v1174_v16, %v1174_v16 }
 0x1ec   : > { %v1306_v21 = vsel %vm1301_vm2, %v1175_v17, 0  ;;  %v1352_v22 = vsel %vm1301_vm2, %v1176_v19, 0 }
 0x1ed   : > { %3085 = vmatpush3.bf16.xpose.msra.mxu1 %v1306_v21  ;;  %3091 = vmatpush3.bf16.xpose.msra.mxu0 %v1352_v22 }
 0x1ee   : > { %3096 = vmatprep.subr.bf16.mxu1 %v3273_v1  ;;  %3102 = vmatprep.subr.bf16.mxu0 %v3273_v1 }
 0x1f4   : > { %3087 = vmatmul.mubr.msk.bf16.vlgmr.msra.gmra.mrb[4].mxu1 %vm1301_vm2, %v1051_v26  ;;  %3093 = vmatmul.mubr.msk.bf16.vlgmr.msra.gmra.mrb[0].mxu0 %vm1301_vm2, %v1052_v27 }
 0x1f5   : > { %3098 = vmatprep.mubr.msk.bf16.mxu1 %vm3274_vm0, %v3273_v1  ;;  %3104 = vmatprep.mubr.msk.bf16.mxu0 %vm3274_vm0, %v3273_v1 }
 0x2c7   : > { %v1342_v35 = vpop.f32.mrb[4].mxu1  ;;  %v1388_v36 = vpop.f32.mrb[0].mxu0 }
 0x2c8   : > { %v1394_v37 = vmul.f32 0.35355338, %v1342_v35  ;;  %v1395_v38 = vmul.f32 0.35355338, %v1388_v36  ;;  %v3088_v39 = vpop.f32.mrb[5].mxu1  ;;  %v3094_v40 = vpop.f32.mrb[1].mxu0 }
 0x2c9   : > { %v1345_v41 = vpop.f32.mrb[6].mxu1  ;;  %v1391_v42 = vpop.f32.mrb[2].mxu0 }
 0x2ca   : > { %v3089_v43 = vpop.f32.mrb[7].mxu1  ;;  %v3095_v44 = vpop.f32.mrb[3].mxu0  ;;  %v1414_v45 = vsel %vm1410_vm6, -1e+09, %v1395_v38  ;;  %v1413_v46 = vsel %vm1410_vm6, -1e+09, %v1394_v37 }
 0x2cb   : > { %v1418_v13 = vsel %vm1301_vm2, %v1414_v45, -inf  ;;  %v1415_v47 = vsel %vm1301_vm2, %v1413_v46, -inf }
 0x2cc   : > { %1419 = vmax.xlane.f32.xlu0 %v1418_v13  ;;  %1416 = vmax.xlane.f32.xlu1 %v1415_v47 }
 0x359   : > { %v1420_v48 = vpop.xlane.xlu0 %1419  ;;  %v1417_v49 = vpop.xlane.xlu1 %1416 }
 0x35a   : > { %v1422_v50 = vsub.f32 %v1414_v45, %v1420_v48  ;;  %v1421_v51 = vsub.f32 %v1413_v46, %v1417_v49 }
 0x35c   : > { %v1425_v52 = vmul.f32 1.442695, %v1422_v50  ;;  %v1423_v53 = vmul.f32 1.442695, %v1421_v51 }
 0x35e   : > { %3227 = vpow2.f32 %v1425_v52 }
 0x35f   : > { %3229 = vpow2.f32 %v1423_v53 }
 0x368   : > { %v3228_v54 = vpop.eup %3227 }
 0x369   : > { %v3230_v55 = vpop.eup %3229  ;;  %v1430_v56 = vsel %vm1301_vm2, %v3228_v54, 0.0 }
 0x36a   : > { %1431 = vadd.xlane.f32.xlu1 %v1430_v56  ;;  %v1427_v57 = vsel %vm1301_vm2, %v3230_v55, 0.0 }
 0x36b   : > { %1428 = vadd.xlane.f32.xlu0 %v1427_v57 }
 0x37b   : > { %1179 = vrot.lane.b32.xlu1 %v3468_v10, %s3280_s0 }
 0x381   : > { %1177 = vrot.lane.b32.xlu0 %v3462_v6, %s3280_s0  ;;  %s3867_s0 = sld [smem:[#allocation9_spill]] }
 0x3f7   : > { %v1432_v58 = vpop.xlane.xlu1 %1431 }
 0x3f8   : > { %v1429_v59 = vpop.xlane.xlu0 %1428  ;;  %3231 = vrcp.f32 %v1432_v58 }
 0x3f9   : > { %3233 = vrcp.f32 %v1429_v59 }
 0x3fb   : > { %v1180_v60 = vpop.permute.xlu1 %1179 }
 0x3fc   : > { %v1178_v61 = vpop.permute.xlu0 %1177  ;;  %v1198_v62 = vcombine.high %v1180_v60, %v3273_v1  ;;  %v1205_v63 = vrot.slane %v1180_v60, %v3480_v18 }
 0x3fd   : > { %v1183_v0 = vcombine.high %v1178_v61, %v3273_v1  ;;  %v1190_v2 = vrot.slane %v1178_v61, %v3480_v18 }
 0x3fe   : > { %v1212_v4 = vrot.slane %v1198_v62, %v3480_v18 }
 0x3ff   : > { %v1197_v5 = vrot.slane %v1183_v0, %v3480_v18  ;;  %v1213_v7 = vcombine.low %v1190_v2, %v1205_v63  ;;  %v1214_v10 = vcombine.high %v1190_v2, %v1205_v63  ;;  %v3215_v63 = vld [vmem:[%s3866_s4] sm:$0xff]  }
 0x401   : > { %v1221_v6 = vrot.slane %v1213_v7, %v3490_v30  ;;  %v1228_v8 = vrot.slane %v1214_v10, %v3490_v30  ;;  %v1229_v9 = vcombine.low %v1197_v5, %v1212_v4  ;;  %v1230_v11 = vcombine.high %v1197_v5, %v1212_v4 }
 0x402   : > { %v3232_v27 = vpop.eup %3231 }
 0x403   : > { %v1237_v12 = vrot.slane %v1229_v9, %v3490_v30  ;;  %v1244_v14 = vrot.slane %v1230_v11, %v3490_v30  ;;  %v1249_v16 = vcombine.low %v1221_v6, %v1228_v8  ;;  %v2987_v17 = vcombine.high %v1221_v6, %v1228_v8  ;;  %v3234_v33 = vpop.eup %3233 }
 0x404   : > { %v1435_v36 = vmul.f32 %v3234_v33, %v3230_v55  ;;  %v1436_v37 = vmul.f32 %v3232_v27, %v3228_v54 }
 0x405   : > { %v1256_v19 = vrot.slane %v1249_v16, %v3480_v18  ;;  %v1265_v20 = vcombine.low %v1237_v12, %v1244_v14  ;;  %v2988_v21 = vcombine.high %v1237_v12, %v1244_v14  ;;  %v1264_v22 = vrot.slane %v2987_v17, %v3480_v18 }
 0x406   : > { %v1437_v42 = vpack.c.bf16 %v1435_v36, %v1435_v36  ;;  %v1438_v43 = vpack.c.bf16 %v1436_v37, %v1436_v37  ;;  %v3216_v36 = vld [vmem:[%s3836_s13] sm:$0xff]   ;;  %v3217_v37 = vld [vmem:[%s3836_s13 + $0x8] sm:$0xff]  }
 0x407   : > { %v1272_v23 = vrot.slane %v1265_v20, %v3480_v18  ;;  %v1280_v24 = vrot.slane %v2988_v21, %v3480_v18  ;;  %v1281_v25 = vcombine.low %v1256_v19, %v1264_v22 }
 0x409   : > { %v1289_v26 = vcombine.low %v1272_v23, %v1280_v24  ;;  %v1288_v28 = vrot.slane %v1281_v25, %v3490_v30  ;;  %v2995_v24 = vld [vmem:[%s3867_s0] ss:$0 sm:$0xff]  ;;  %v1710_v25 = vunpack.c.l.bf16 %v3453_v3  ;;  %s3868_s0 = sld [smem:[#allocation3_spill]] }
 0x40b   : > { %v1296_v32 = vrot.slane %v1289_v26, %v3490_v30 }
 0x40d   : > { %v1297_v34 = vcombine.low %v1288_v28, %v1296_v32  ;;  %v1298_v35 = vcombine.high %v1288_v28, %v1296_v32 }
 0x40f   : > { %v1299_v38 = vpack.c.bf16 %v1297_v34, %v1297_v34  ;;  %v1300_v39 = vpack.c.bf16 %v1298_v35, %v1298_v35  ;;  %s839_s8 = scalar_lea.vmem %s3868_s0, %s3446_s27  ;;  %s845_s0 = scalar_lea.vmem %s3870_s5, %s3878_s29 }
 0x410   : > { %v855_v3 = vld [vmem:[%s839_s8] sm:$0xf]  ;;  %s3871_s29 = smov 112   ;;  %s3872_s8 = smov 8  }
 0x411   : > { %v1444_v40 = vsel %vm1442_vm7, %v1299_v38, 0  ;;  %v1490_v41 = vsel %vm1442_vm7, %v1300_v39, 0 }
 0x412   : > { %3097 = vmatpush3.bf16.msra.mxu1 %v1444_v40  ;;  %3103 = vmatpush3.bf16.msra.mxu0 %v1490_v41 }
 0x413   : > { %3108 = vmatprep.subr.bf16.mxu1 %v3273_v1  ;;  %3114 = vmatprep.subr.bf16.mxu0 %v3273_v1 }
 0x415   : > { %3099 = vmatmul.mubr.msk.bf16.vlgmr.msra.gmra.mrb[8].mxu1 %vm1301_vm2, %v1437_v42  ;;  %3105 = vmatmul.mubr.msk.bf16.vlgmr.msra.gmra.mrb[4].mxu0 %vm1301_vm2, %v1438_v43  ;;  %v3218_v43 = vld [vmem:[%s3834_s11] sm:$0xff]  }
 0x416   : > { %3110 = vmatprep.mubr.msk.bf16.mxu1 %vm3274_vm0, %v3273_v1  ;;  %3118 = vmatprep.mubr.msk.bf16.mxu0 %vm3274_vm0, %v3273_v1 }
 0x417   : > { %3109 = vmatpush3.bf16.msra.mxu1 %v3215_v63  ;;  %3115 = vmatpush3.bf16.msra.mxu0 %v3218_v43 }
 0x418   : > { %3122 = vmatprep.subr.bf16.mxu1 %v3273_v1  ;;  %3116 = vmatprep.subr.bf16.mxu0 %v3273_v1 }
 0x4e8   : > { %v1480_v44 = vpop.f32.mrb[8].mxu1  ;;  %v1526_v45 = vpop.f32.mrb[4].mxu0 }
 0x4e9   : > { %v1532_v46 = vcombine.high %v1480_v44, %v3273_v1  ;;  %v1539_v13 = vrot.slane %v1480_v44, %v3480_v18  ;;  %v1547_v47 = vcombine.high %v1526_v45, %v3273_v1  ;;  %v1554_v48 = vrot.slane %v1526_v45, %v3480_v18  ;;  %v3100_v49 = vpop.f32.mrb[9].mxu1  ;;  %v3106_v50 = vpop.f32.mrb[5].mxu0  ;;  %v3219_v44 = vld [vmem:[%s3834_s11 + $0x8] sm:$0xff]   ;;  %v3004_v45 = vld [vmem:[%s3837_s14] ss:$0 sm:$0xff] }
 0x4ea   : > { %v1483_v51 = vpop.f32.mrb[10].mxu1  ;;  %v1529_v52 = vpop.f32.mrb[6].mxu0  ;;  %3117 = vmatpush3.bf16.msra.mxu0 %v3219_v44 }
 0x4eb   : > { %v1546_v53 = vrot.slane %v1532_v46, %v3480_v18  ;;  %v1561_v54 = vrot.slane %v1547_v47, %v3480_v18  ;;  %v1562_v55 = vcombine.low %v1539_v13, %v1554_v48  ;;  %v1563_v56 = vcombine.high %v1539_v13, %v1554_v48  ;;  %v3101_v57 = vpop.f32.mrb[11].mxu1  ;;  %v3107_v58 = vpop.f32.mrb[7].mxu0  ;;  %3130 = vmatprep.subr.bf16.mxu0 %v3273_v1 }
 0x4ed   : > { %v1570_v59 = vrot.slane %v1562_v55, %v3490_v30  ;;  %v1577_v60 = vrot.slane %v1563_v56, %v3490_v30  ;;  %v1578_v61 = vcombine.low %v1546_v53, %v1561_v54  ;;  %v1579_v62 = vcombine.high %v1546_v53, %v1561_v54  ;;  %v2999_v56 = vld [vmem:[%s3833_s10] ss:$0 sm:$0xff] }
 0x4ef   : > { %v1586_v0 = vrot.slane %v1578_v61, %v3490_v30  ;;  %v1593_v2 = vrot.slane %v1579_v62, %v3490_v30  ;;  %v1598_v4 = vcombine.low %v1570_v59, %v1577_v60  ;;  %v2993_v5 = vcombine.high %v1570_v59, %v1577_v60 }
 0x4f1   : > { %v1605_v7 = vrot.slane %v1598_v4, %v3480_v18  ;;  %v1613_v10 = vrot.slane %v2993_v5, %v3480_v18  ;;  %v1614_v6 = vcombine.low %v1586_v0, %v1593_v2  ;;  %v2994_v8 = vcombine.high %v1586_v0, %v1593_v2 }
 0x4f3   : > { %v1621_v9 = vrot.slane %v1614_v6, %v3480_v18  ;;  %v1629_v11 = vrot.slane %v2994_v8, %v3480_v18  ;;  %v1630_v12 = vcombine.low %v1605_v7, %v1613_v10 }
 0x4f5   : > { %v1638_v14 = vcombine.low %v1621_v9, %v1629_v11  ;;  %v1637_v16 = vrot.slane %v1630_v12, %v3490_v30 }
 0x4f7   : > { %v1645_v17 = vrot.slane %v1638_v14, %v3490_v30 }
 0x4f9   : > { %v1647_v19 = vcombine.high %v1637_v16, %v1645_v17  ;;  %v1646_v20 = vcombine.low %v1637_v16, %v1645_v17 }
 0x4fb   : > { %1649 = vrot.lane.b32.xlu1 %v1647_v19, %s3850_s28  ;;  %s3869_s28 = sld [smem:[#allocation10_spill]] }
 0x501   : > { %v2998_v54 = vld [vmem:[%s3869_s28] ss:$0 sm:$0xff] }
 0x56d   : > { %v1650_v21 = vpop.permute.xlu1 %1649 }
 0x56e   : > { %v1652_v22 = vsel %vm1301_vm2, %v1646_v20, %v1650_v21 }
 0x56f   : > { %v1653_v23 = vpack.c.bf16 %v1652_v22, %v1652_v22 }
 0x571   : > { %3111 = vmatmul.mubr.msk.bf16.vlgmr.msra.gmra.mrb[12].mxu1 %vm1666_vm8, %v1653_v23 }
 0x572   : > { %3126 = vmatprep.mubr.msk.bf16.mxu1 %vm3274_vm0, %v3273_v1  ;;  %3123 = vmatpush3.bf16.msra.mxu1 %v3216_v36 }
 0x573   : > { %3124 = vmatprep.subr.bf16.mxu1 %v3273_v1 }
 0x576   : > { %3125 = vmatpush3.bf16.msra.mxu1 %v3217_v37  ;;  %v3000_v37 = vld [vmem:[%s3835_s12] ss:$0 sm:$0xff] }
 0x577   : > { %3136 = vmatprep.subr.bf16.mxu1 %v3273_v1 }
 0x579   : > { %3127 = vmatmul.mubr.msk.bf16.vlgmr.msra.gmra.mrb[16].mxu1 %vm887_vm1, %v855_v3 }
 0x57a   : > { %3138 = vmatprep.mubr.msk.bf16.mxu1 %vm3274_vm0, %v3273_v1 }
 0x644   : > { %v1704_v26 = vpop.f32.mrb[12].mxu1 }
 0x645   : > { %v1705_v27 = vadd.f32 %v2995_v24, %v1704_v26  ;;  %v3112_v28 = vpop.f32.mrb[13].mxu1 }
 0x646   : > { %v1707_v32 = vpop.f32.mrb[14].mxu1 }
 0x647   : > { %v3113_v33 = vpop.f32.mrb[15].mxu1  ;;  %v1711_v34 = vadd.f32 %v1710_v25, %v1705_v27 }
 0x649   : > { %v1712_v35 = vsel %vm887_vm1, %v1711_v34, 0.0 }
 0x64a   : > { %1713 = vadd.xlane.f32.xlu0 %v1712_v35 }
 0x64c   : > { %v1872_v46 = vpop.f32.mrb[16].mxu1 }
 0x64d   : > { %v3626_v13 = vadd.f32 %v3004_v45, %v1872_v46  ;;  %v3128_v47 = vpop.f32.mrb[17].mxu1 }
 0x64e   : > { %v1875_v48 = vpop.f32.mrb[18].mxu1 }
 0x64f   : > { %v3129_v49 = vpop.f32.mrb[19].mxu1  ;;  %v2004_v61 = vcombine.high %v3626_v13, %v3273_v1  ;;  %v2011_v63 = vrot.slane %v3626_v13, %v3480_v18 }
 0x651   : > { %v2018_v2 = vrot.slane %v2004_v61, %v3480_v18 }
 0x660   : > { %2001 = vrot.lane.b32.xlu0 %v3626_v13, %s3275_s1 }
 0x6d7   : > { %v1714_v38 = vpop.xlane.xlu0 %1713 }
 0x6d8   : > { %v1716_v39 = vmul.f32 0.03125, %v1714_v38 }
 0x6da   : > { %v1717_v40 = vsub.f32 %v1711_v34, %v1716_v39 }
 0x6db   : > { %v3643_v60 = vpop.permute.xlu0 %2001 }
 0x6dc   : > { %v1718_v41 = vmul.f32 %v1717_v40, %v1717_v40  ;;  %v2019_v62 = vcombine.high %v3643_v60, %v3273_v1  ;;  %v2026_v0 = vrot.slane %v3643_v60, %v3480_v18 }
 0x6de   : > { %v1719_v42 = vsel %vm887_vm1, %v1718_v41, 0.0  ;;  %v2033_v4 = vrot.slane %v2019_v62, %v3480_v18  ;;  %v2034_v5 = vcombine.low %v2011_v63, %v2026_v0  ;;  %v2035_v7 = vcombine.high %v2011_v63, %v2026_v0 }
 0x6df   : > { %1720 = vadd.xlane.f32.xlu1 %v1719_v42 }
 0x6e0   : > { %v2050_v10 = vcombine.low %v2018_v2, %v2033_v4  ;;  %v2051_v6 = vcombine.high %v2018_v2, %v2033_v4  ;;  %v2042_v8 = vrot.slane %v2034_v5, %v3490_v30  ;;  %v2049_v9 = vrot.slane %v2035_v7, %v3490_v30 }
 0x6e2   : > { %v2058_v11 = vrot.slane %v2050_v10, %v3490_v30  ;;  %v2065_v12 = vrot.slane %v2051_v6, %v3490_v30  ;;  %v2070_v14 = vcombine.low %v2042_v8, %v2049_v9  ;;  %v3010_v16 = vcombine.high %v2042_v8, %v2049_v9 }
 0x6e4   : > { %v2086_v17 = vcombine.low %v2058_v11, %v2065_v12  ;;  %v3011_v19 = vcombine.high %v2058_v11, %v2065_v12  ;;  %v2077_v20 = vrot.slane %v2070_v14, %v3480_v18  ;;  %v2085_v21 = vrot.slane %v3010_v16, %v3480_v18  ;;  %v857_v14 = vld [vmem:[%s845_s0] sm:$0x1] }
 0x6e5   : > { %vm2340_vm9 = vcmp.gt.f32.partialorder %v857_v14, 0.5 }
 0x6e6   : > { %v2093_v22 = vrot.slane %v2086_v17, %v3480_v18  ;;  %v2101_v23 = vrot.slane %v3011_v19, %v3480_v18  ;;  %v2102_v24 = vcombine.low %v2077_v20, %v2085_v21  ;;  %v2341_v16 = vsel %vm2340_vm9, 1, %v3279_v31 }
 0x6e7   : > { %v2345_v17 = vrot.slane %v2341_v16, %v1407_v29 }
 0x6e8   : > { %v2110_v25 = vcombine.low %v2093_v22, %v2101_v23  ;;  %v2109_v26 = vrot.slane %v2102_v24, %v3490_v30 }
 0x6e9   : > { %vm2346_vm10 = vcmp.eq.s32.totalorder %v2345_v17, 1 }
 0x6ea   : > { %v2117_v27 = vrot.slane %v2110_v25, %v3490_v30 }
 0x6ec   : > { %v2118_v28 = vcombine.low %v2109_v26, %v2117_v27  ;;  %v2119_v32 = vcombine.high %v2109_v26, %v2117_v27 }
 0x6ee   : > { %v2120_v33 = vpack.c.bf16 %v2118_v28, %v2118_v28  ;;  %v2121_v34 = vpack.c.bf16 %v2119_v32, %v2119_v32 }
 0x6f0   : > { %v2250_v35 = vsel %vm1301_vm2, %v2120_v33, 0  ;;  %v2296_v36 = vsel %vm1301_vm2, %v2121_v34, 0 }
 0x6f1   : > { %3137 = vmatpush3.bf16.xpose.msra.mxu1 %v2296_v36 }
 0x6f2   : > { %3148 = vmatprep.subr.bf16.mxu1 %v3273_v1 }
 0x76c   : > { %v1721_v50 = vpop.xlane.xlu1 %1720 }
 0x76d   : > { %v1722_v51 = vmul.f32 0.03125, %v1721_v50 }
 0x76f   : > { %v1723_v52 = vadd.f32 1e-05, %v1722_v51 }
 0x771   : > { %3235 = vrsqrt.f32 %v1723_v52 }
 0x77b   : > { %v3236_v53 = vpop.eup %3235 }
 0x77c   : > { %v1725_v55 = vmul.f32 %v3236_v53, %v1717_v40 }
 0x77e   : > { %v1732_v57 = vmul.f32 %v2998_v54, %v1725_v55 }
 0x780   : > { %v3636_v58 = vadd.f32 %v2999_v56, %v1732_v57 }
 0x782   : > { %v1755_v59 = vpack.c.bf16 %v3636_v58, %v3636_v58 }
 0x784   : > { %3119 = vmatmul.mubr.msk.bf16.vlgmr.msra.gmra.mrb[8].mxu0 %vm887_vm1, %v1755_v59 }
 0x785   : > { %3132 = vmatprep.mubr.msk.bf16.mxu0 %vm3274_vm0, %v3273_v1  ;;  %3131 = vmatpush3.bf16.xpose.msra.mxu0 %v2250_v35 }
 0x786   : > { %3142 = vmatprep.subr.bf16.mxu0 %v3273_v1 }
 0x857   : > { %v1811_v3 = vpop.f32.mrb[8].mxu0 }
 0x858   : > { %v1812_v38 = vadd.f32 %v3000_v37, %v1811_v3  ;;  %v3120_v39 = vpop.f32.mrb[9].mxu0 }
 0x859   : > { %v1814_v40 = vpop.f32.mrb[10].mxu0 }
 0x85a   : > { %1879 = vrot.lane.b32.xlu1 %v1812_v38, %s3275_s1  ;;  %v3121_v41 = vpop.f32.mrb[11].mxu0  ;;  %v1882_v42 = vcombine.high %v1812_v38, %v3273_v1  ;;  %v1889_v44 = vrot.slane %v1812_v38, %v3480_v18 }
 0x85c   : > { %v1896_v47 = vrot.slane %v1882_v42, %v3480_v18 }
 0x8cc   : > { %v1880_v43 = vpop.permute.xlu1 %1879 }
 0x8cd   : > { %v1897_v45 = vcombine.high %v1880_v43, %v3273_v1  ;;  %v1904_v46 = vrot.slane %v1880_v43, %v3480_v18 }
 0x8cf   : > { %v1911_v48 = vrot.slane %v1897_v45, %v3480_v18  ;;  %v1912_v49 = vcombine.low %v1889_v44, %v1904_v46  ;;  %v1913_v50 = vcombine.high %v1889_v44, %v1904_v46 }
 0x8d1   : > { %v1920_v51 = vrot.slane %v1912_v49, %v3490_v30  ;;  %v1927_v52 = vrot.slane %v1913_v50, %v3490_v30  ;;  %v1928_v53 = vcombine.low %v1896_v47, %v1911_v48  ;;  %v1929_v54 = vcombine.high %v1896_v47, %v1911_v48 }
 0x8d3   : > { %v1936_v55 = vrot.slane %v1928_v53, %v3490_v30  ;;  %v1943_v56 = vrot.slane %v1929_v54, %v3490_v30  ;;  %v1948_v57 = vcombine.low %v1920_v51, %v1927_v52  ;;  %v3008_v59 = vcombine.high %v1920_v51, %v1927_v52 }
 0x8d5   : > { %v1955_v61 = vrot.slane %v1948_v57, %v3480_v18  ;;  %v1963_v62 = vrot.slane %v3008_v59, %v3480_v18  ;;  %v1964_v63 = vcombine.low %v1936_v55, %v1943_v56  ;;  %v3009_v0 = vcombine.high %v1936_v55, %v1943_v56 }
 0x8d7   : > { %v1971_v2 = vrot.slane %v1964_v63, %v3480_v18  ;;  %v1979_v4 = vrot.slane %v3009_v0, %v3480_v18  ;;  %v1980_v5 = vcombine.low %v1955_v61, %v1963_v62 }
 0x8d9   : > { %v1988_v7 = vcombine.low %v1971_v2, %v1979_v4  ;;  %v1987_v10 = vrot.slane %v1980_v5, %v3490_v30 }
 0x8db   : > { %v1995_v6 = vrot.slane %v1988_v7, %v3490_v30 }
 0x8dd   : > { %v1996_v8 = vcombine.low %v1987_v10, %v1995_v6  ;;  %v1997_v9 = vcombine.high %v1987_v10, %v1995_v6 }
 0x8df   : > { %v1998_v11 = vpack.c.bf16 %v1996_v8, %v1996_v8  ;;  %v1999_v12 = vpack.c.bf16 %v1997_v9, %v1997_v9 }
 0x8e1   : > { %3133 = vmatmul.mubr.msk.bf16.vlgmr.msra.gmra.mrb[12].mxu0 %vm1301_vm2, %v1998_v11  ;;  %3139 = vmatmul.mubr.msk.bf16.vlgmr.msra.gmra.mrb[20].mxu1 %vm1301_vm2, %v1999_v12 }
 0x8e2   : > { %3144 = vmatprep.mubr.msk.bf16.mxu0 %vm3274_vm0, %v3273_v1  ;;  %3150 = vmatprep.mubr.msk.bf16.mxu1 %vm3274_vm0, %v3273_v1 }
 0x9b4   : > { %v2286_v19 = vpop.f32.mrb[12].mxu0  ;;  %v2332_v20 = vpop.f32.mrb[20].mxu1 }
 0x9b5   : > { %v2338_v21 = vmul.f32 0.35355338, %v2286_v19  ;;  %v2339_v22 = vmul.f32 0.35355338, %v2332_v20  ;;  %v3134_v23 = vpop.f32.mrb[13].mxu0  ;;  %v3140_v24 = vpop.f32.mrb[21].mxu1 }
 0x9b6   : > { %v2289_v25 = vpop.f32.mrb[14].mxu0  ;;  %v2335_v26 = vpop.f32.mrb[22].mxu1 }
 0x9b7   : > { %v3135_v27 = vpop.f32.mrb[15].mxu0  ;;  %v3141_v28 = vpop.f32.mrb[23].mxu1  ;;  %v2347_v32 = vsel %vm2346_vm10, -1e+09, %v2338_v21  ;;  %v2348_v33 = vsel %vm2346_vm10, -1e+09, %v2339_v22 }
 0x9b8   : > { %v2349_v34 = vsel %vm1301_vm2, %v2347_v32, -inf  ;;  %v2352_v31 = vsel %vm1301_vm2, %v2348_v33, -inf }
 0x9b9   : > { %2350 = vmax.xlane.f32.xlu0 %v2349_v34  ;;  %2353 = vmax.xlane.f32.xlu1 %v2352_v31 }
 0x9ca   : > { %2122 = vrot.lane.b32.xlu1 %v3626_v13, %s3871_s29 }
 0xa46   : > { %v2351_v15 = vpop.xlane.xlu0 %2350  ;;  %v2354_v29 = vpop.xlane.xlu1 %2353 }
 0xa47   : > { %v2355_v35 = vsub.f32 %v2347_v32, %v2351_v15  ;;  %v2356_v36 = vsub.f32 %v2348_v33, %v2354_v29 }
 0xa49   : > { %v2357_v37 = vmul.f32 1.442695, %v2355_v35  ;;  %v2359_v3 = vmul.f32 1.442695, %v2356_v36 }
 0xa4a   : > { %v2123_v42 = vpop.permute.xlu1 %2122 }
 0xa4b   : > { %3237 = vpow2.f32 %v2357_v37  ;;  %v2128_v44 = vcombine.high %v2123_v42, %v3273_v1  ;;  %v2135_v46 = vrot.slane %v2123_v42, %v3480_v18 }
 0xa4c   : > { %3239 = vpow2.f32 %v2359_v3 }
 0xa4d   : > { %v2142_v49 = vrot.slane %v2128_v44, %v3480_v18 }
 0xa55   : > { %v3238_v38 = vpop.eup %3237 }
 0xa56   : > { %v2361_v39 = vsel %vm1301_vm2, %v3238_v38, 0.0  ;;  %v3240_v40 = vpop.eup %3239 }
 0xa57   : > { %2362 = vadd.xlane.f32.xlu0 %v2361_v39  ;;  %v2364_v41 = vsel %vm1301_vm2, %v3240_v40, 0.0 }
 0xa5b   : > { %2365 = vadd.xlane.f32.xlu0 %v2364_v41 }
 0xa71   : > { %2124 = vrot.lane.b32.xlu0 %v3643_v60, %s3871_s29 }
 0xae4   : > { %v2363_v13 = vpop.xlane.xlu0 %2362 }
 0xae5   : > { %3241 = vrcp.f32 %v2363_v13 }
 0xae8   : > { %v2366_v43 = vpop.xlane.xlu0 %2365 }
 0xae9   : > { %3243 = vrcp.f32 %v2366_v43  ;;  %v3220_v43 = vld [vmem:[%s3838_s15] sm:$0xff]  }
 0xaec   : > { %v2125_v45 = vpop.permute.xlu0 %2124 }
 0xaed   : > { %v2143_v47 = vcombine.high %v2125_v45, %v3273_v1  ;;  %v2150_v48 = vrot.slane %v2125_v45, %v3480_v18 }
 0xaef   : > { %v2157_v50 = vrot.slane %v2143_v47, %v3480_v18  ;;  %v2158_v51 = vcombine.low %v2135_v46, %v2150_v48  ;;  %v2159_v52 = vcombine.high %v2135_v46, %v2150_v48  ;;  %v3242_v6 = vpop.eup %3241 }
 0xaf0   : > { %v2369_v16 = vmul.f32 %v3242_v6, %v3238_v38 }
 0xaf1   : > { %v2166_v60 = vrot.slane %v2158_v51, %v3490_v30  ;;  %v2173_v53 = vrot.slane %v2159_v52, %v3490_v30  ;;  %v2174_v54 = vcombine.low %v2142_v49, %v2157_v50  ;;  %v2175_v55 = vcombine.high %v2142_v49, %v2157_v50 }
 0xaf2   : > { %v2371_v23 = vpack.c.bf16 %v2369_v16, %v2369_v16  ;;  %v3222_v16 = vld [vmem:[%s3842_s19 + $0x8] sm:$0xff]  }
 0xaf3   : > { %v2182_v56 = vrot.slane %v2174_v54, %v3490_v30  ;;  %v2189_v57 = vrot.slane %v2175_v55, %v3490_v30  ;;  %v2194_v59 = vcombine.low %v2166_v60, %v2173_v53  ;;  %v3012_v61 = vcombine.high %v2166_v60, %v2173_v53  ;;  %v3244_v11 = vpop.eup %3243 }
 0xaf4   : > { %v2370_v17 = vmul.f32 %v3244_v11, %v3240_v40 }
 0xaf5   : > { %v2201_v62 = vrot.slane %v2194_v59, %v3480_v18  ;;  %v2209_v63 = vrot.slane %v3012_v61, %v3480_v18  ;;  %v2210_v0 = vcombine.low %v2182_v56, %v2189_v57  ;;  %v3013_v2 = vcombine.high %v2182_v56, %v2189_v57 }
 0xaf6   : > { %v2372_v24 = vpack.c.bf16 %v2370_v17, %v2370_v17  ;;  %v3224_v17 = vld [vmem:[%s3844_s21 + $0x8] sm:$0xff]  }
 0xaf7   : > { %v2217_v4 = vrot.slane %v2210_v0, %v3480_v18  ;;  %v2225_v5 = vrot.slane %v3013_v2, %v3480_v18  ;;  %v2226_v7 = vcombine.low %v2201_v62, %v2209_v63 }
 0xaf9   : > { %v2234_v10 = vcombine.low %v2217_v4, %v2225_v5  ;;  %v2233_v8 = vrot.slane %v2226_v7, %v3490_v30 }
 0xafb   : > { %v2241_v9 = vrot.slane %v2234_v10, %v3490_v30 }
 0xafd   : > { %v2242_v12 = vcombine.low %v2233_v8, %v2241_v9  ;;  %v2243_v14 = vcombine.high %v2233_v8, %v2241_v9 }
 0xaff   : > { %v2244_v19 = vpack.c.bf16 %v2242_v12, %v2242_v12  ;;  %v2245_v20 = vpack.c.bf16 %v2243_v14, %v2243_v14  ;;  %v3221_v14 = vld [vmem:[%s3842_s19] sm:$0xff]  }
 0xb01   : > { %v2377_v21 = vsel %vm1442_vm7, %v2244_v19, 0  ;;  %v2423_v22 = vsel %vm1442_vm7, %v2245_v20, 0 }
 0xb02   : > { %3143 = vmatpush3.bf16.msra.mxu0 %v2377_v21  ;;  %3149 = vmatpush3.bf16.msra.mxu1 %v2423_v22 }
 0xb03   : > { %3154 = vmatprep.subr.bf16.mxu0 %v3273_v1  ;;  %3160 = vmatprep.subr.bf16.mxu1 %v3273_v1 }
 0xb05   : > { %3145 = vmatmul.mubr.msk.bf16.vlgmr.msra.gmra.mrb[16].mxu0 %vm1301_vm2, %v2371_v23  ;;  %3151 = vmatmul.mubr.msk.bf16.vlgmr.msra.gmra.mrb[24].mxu1 %vm1301_vm2, %v2372_v24  ;;  %v3023_v23 = vld [vmem:[%s3840_s17] ss:$0 sm:$0xff] }
 0xb06   : > { %3156 = vmatprep.mubr.msk.bf16.mxu0 %vm3274_vm0, %v3273_v1  ;;  %3164 = vmatprep.mubr.msk.bf16.mxu1 %vm3274_vm0, %v3273_v1 }
 0xb07   : > { %3155 = vmatpush3.bf16.msra.mxu0 %v3220_v43  ;;  %3161 = vmatpush3.bf16.msra.mxu1 %v3221_v14 }
 0xb08   : > { %3168 = vmatprep.subr.bf16.mxu0 %v3273_v1  ;;  %3162 = vmatprep.subr.bf16.mxu1 %v3273_v1 }
 0xb0b   : > { %3163 = vmatpush3.bf16.msra.mxu1 %v3222_v16 }
 0xbd8   : > { %v2413_v25 = vpop.f32.mrb[16].mxu0  ;;  %v2459_v26 = vpop.f32.mrb[24].mxu1 }
 0xbd9   : > { %v2465_v27 = vcombine.high %v2413_v25, %v3273_v1  ;;  %v2472_v28 = vrot.slane %v2413_v25, %v3480_v18  ;;  %v2480_v32 = vcombine.high %v2459_v26, %v3273_v1  ;;  %v2487_v33 = vrot.slane %v2459_v26, %v3480_v18  ;;  %v3146_v34 = vpop.f32.mrb[17].mxu0  ;;  %v3152_v31 = vpop.f32.mrb[25].mxu1  ;;  %v3024_v25 = vld [vmem:[%s3841_s18] ss:$0 sm:$0xff] }
 0xbda   : > { %v2416_v15 = vpop.f32.mrb[18].mxu0  ;;  %v2462_v29 = vpop.f32.mrb[26].mxu1  ;;  %v3025_v34 = vld [vmem:[%s3843_s20] ss:$0 sm:$0xff] }
 0xbdb   : > { %v2479_v35 = vrot.slane %v2465_v27, %v3480_v18  ;;  %v2494_v36 = vrot.slane %v2480_v32, %v3480_v18  ;;  %v2495_v37 = vcombine.low %v2472_v28, %v2487_v33  ;;  %v2496_v3 = vcombine.high %v2472_v28, %v2487_v33  ;;  %v3147_v38 = vpop.f32.mrb[19].mxu0  ;;  %v3153_v39 = vpop.f32.mrb[27].mxu1  ;;  %v3225_v32 = vld [vmem:[%s3844_s21 + $0x10] sm:$0xff]   ;;  %v3226_v33 = vld [vmem:[%s3844_s21 + $0x18] sm:$0xff]  }
 0xbdd   : > { %v2503_v40 = vrot.slane %v2495_v37, %v3490_v30  ;;  %v2510_v41 = vrot.slane %v2496_v3, %v3490_v30  ;;  %v2511_v13 = vcombine.low %v2479_v35, %v2494_v36  ;;  %v2512_v42 = vcombine.high %v2479_v35, %v2494_v36 }
 0xbdf   : > { %v2519_v44 = vrot.slane %v2511_v13, %v3490_v30  ;;  %v2526_v45 = vrot.slane %v2512_v42, %v3490_v30  ;;  %v2531_v46 = vcombine.low %v2503_v40, %v2510_v41  ;;  %v3018_v47 = vcombine.high %v2503_v40, %v2510_v41 }
 0xbe1   : > { %v2538_v48 = vrot.slane %v2531_v46, %v3480_v18  ;;  %v2546_v49 = vrot.slane %v3018_v47, %v3480_v18  ;;  %v2547_v50 = vcombine.low %v2519_v44, %v2526_v45  ;;  %v3019_v51 = vcombine.high %v2519_v44, %v2526_v45 }
 0xbe3   : > { %v2554_v52 = vrot.slane %v2547_v50, %v3480_v18  ;;  %v2562_v60 = vrot.slane %v3019_v51, %v3480_v18  ;;  %v2563_v53 = vcombine.low %v2538_v48, %v2546_v49  ;;  %v3020_v18 = vld [vmem:[%s3839_s16] ss:$0 sm:$0xff] }
 0xbe5   : > { %v2571_v54 = vcombine.low %v2554_v52, %v2562_v60  ;;  %v2570_v55 = vrot.slane %v2563_v53, %v3490_v30  ;;  %v3035_v60 = vld [vmem:[%s3846_s23] ss:$0 sm:$0xff] }
 0xbe7   : > { %v2578_v56 = vrot.slane %v2571_v54, %v3490_v30  ;;  %v3036_v54 = vld [vmem:[%s3847_s24] ss:$0 sm:$0xff] }
 0xbe9   : > { %v2580_v57 = vcombine.high %v2570_v55, %v2578_v56  ;;  %v2579_v59 = vcombine.low %v2570_v55, %v2578_v56 }
 0xbeb   : > { %2582 = vrot.lane.b32.xlu1 %v2580_v57, %s3872_s8 }
 0xc5d   : > { %v2583_v61 = vpop.permute.xlu1 %2582 }
 0xc5e   : > { %v2585_v62 = vsel %vm1301_vm2, %v2579_v59, %v2583_v61 }
 0xc5f   : > { %v2586_v63 = vpack.c.bf16 %v2585_v62, %v2585_v62 }
 0xc61   : > { %3157 = vmatmul.mubr.msk.bf16.vlgmr.msra.gmra.mrb[20].mxu0 %vm1666_vm8, %v2586_v63 }
 0xc62   : > { %3176 = vmatprep.mubr.msk.bf16.mxu0 %vm3274_vm0, %v3273_v1 }
 0xd34   : > { %v2636_v0 = vpop.f32.mrb[20].mxu0 }
 0xd35   : > { %v2637_v2 = vadd.f32 %v3020_v18, %v2636_v0  ;;  %v3158_v30 = vpop.f32.mrb[21].mxu0 }
 0xd36   : > { %v2639_v4 = vpop.f32.mrb[22].mxu0 }
 0xd37   : > { %v3159_v5 = vpop.f32.mrb[23].mxu0  ;;  %v2642_v7 = vadd.f32 %v2637_v2, %v3636_v58  ;;  %v3223_v58 = vld [vmem:[%s3844_s21] sm:$0xff]  }
 0xd38   : > { %3169 = vmatpush3.bf16.msra.mxu0 %v3223_v58 }
 0xd39   : > { %v2643_v10 = vsel %vm887_vm1, %v2642_v7, 0.0  ;;  %3170 = vmatprep.subr.bf16.mxu0 %v3273_v1 }
 0xd3a   : > { %2644 = vadd.xlane.f32.xlu1 %v2643_v10 }
 0xd3c   : > { %3171 = vmatpush3.bf16.msra.mxu0 %v3224_v17 }
 0xd3d   : > { %3172 = vmatprep.subr.bf16.mxu0 %v3273_v1 }
 0xd40   : > { %3173 = vmatpush3.bf16.msra.mxu0 %v3225_v32 }
 0xd41   : > { %3174 = vmatprep.subr.bf16.mxu0 %v3273_v1  ;;  %v3029_v1 = vld [vmem:[%s3845_s22] ss:$0 sm:$0xff] }
 0xd44   : > { %3175 = vmatpush3.bf16.msra.mxu0 %v3226_v33 }
 0xdc7   : > { %v2645_v6 = vpop.xlane.xlu1 %2644 }
 0xdc8   : > { %v2646_v8 = vmul.f32 0.03125, %v2645_v6 }
 0xdca   : > { %v2647_v9 = vsub.f32 %v2642_v7, %v2646_v8 }
 0xdcc   : > { %v2648_v11 = vmul.f32 %v2647_v9, %v2647_v9 }
 0xdce   : > { %v2649_v12 = vsel %vm887_vm1, %v2648_v11, 0.0 }
 0xdcf   : > { %2650 = vadd.xlane.f32.xlu0 %v2649_v12 }
 0xe5c   : > { %v2651_v19 = vpop.xlane.xlu0 %2650 }
 0xe5d   : > { %v2652_v20 = vmul.f32 0.03125, %v2651_v19 }
 0xe5f   : > { %v2653_v21 = vadd.f32 1e-05, %v2652_v20 }
 0xe61   : > { %3245 = vrsqrt.f32 %v2653_v21 }
 0xe6b   : > { %v3246_v22 = vpop.eup %3245 }
 0xe6c   : > { %v2655_v24 = vmul.f32 %v3246_v22, %v2647_v9 }
 0xe6e   : > { %v2662_v26 = vmul.f32 %v3023_v23, %v2655_v24 }
 0xe70   : > { %v2669_v27 = vadd.f32 %v3024_v25, %v2662_v26 }
 0xe72   : > { %v2686_v28 = vpack.c.bf16 %v2669_v27, %v2669_v27 }
 0xe74   : > { %3165 = vmatmul.mubr.msk.bf16.vlgmr.msra.gmra.mrb[28].mxu1 %vm887_vm1, %v2686_v28 }
 0xf47   : > { %v2742_v31 = vpop.f32.mrb[28].mxu1 }
 0xf48   : > { %v2743_v15 = vadd.f32 %v3025_v34, %v2742_v31  ;;  %v3166_v29 = vpop.f32.mrb[29].mxu1 }
 0xf49   : > { %v2745_v35 = vpop.f32.mrb[30].mxu1 }
 0xf4a   : > { %v2748_v36 = vmax.f32 %v2743_v15, 0.0  ;;  %v3167_v37 = vpop.f32.mrb[31].mxu1 }
 0xf4c   : > { %v2749_v3 = vpack.c.bf16 %v2748_v36, %v2748_v36 }
 0xf4e   : > { %3177 = vmatmul.mubr.msk.bf16.vlgmr.msra.gmra.mrb[24].mxu0 %vm2780_vm11, %v2749_v3 }
0x1021   : > { %v2818_v38 = vpop.f32.mrb[24].mxu0 }
0x1022   : > { %v2819_v39 = vadd.f32 %v3029_v1, %v2818_v38  ;;  %v3178_v40 = vpop.f32.mrb[25].mxu0 }
0x1023   : > { %v2821_v41 = vpop.f32.mrb[26].mxu0 }
0x1024   : > { %v3179_v13 = vpop.f32.mrb[27].mxu0  ;;  %v2824_v42 = vadd.f32 %v2819_v39, %v2669_v27 }
0x1026   : > { %v2825_v43 = vsel %vm887_vm1, %v2824_v42, 0.0 }
0x1027   : > { %2826 = vadd.xlane.f32.xlu0 %v2825_v43 }
0x10b4   : > { %v2827_v44 = vpop.xlane.xlu0 %2826 }
0x10b5   : > { %v2828_v45 = vmul.f32 0.03125, %v2827_v44 }
0x10b7   : > { %v2829_v46 = vsub.f32 %v2824_v42, %v2828_v45 }
0x10b9   : > { %v2830_v47 = vmul.f32 %v2829_v46, %v2829_v46 }
0x10bb   : > { %v2831_v48 = vsel %vm887_vm1, %v2830_v47, 0.0 }
0x10bc   : > { %2832 = vadd.xlane.f32.xlu1 %v2831_v48 }
0x1149   : > { %v2833_v49 = vpop.xlane.xlu1 %2832 }
0x114a   : > { %v2834_v50 = vmul.f32 0.03125, %v2833_v49 }
0x114c   : > { %v2835_v51 = vadd.f32 1e-05, %v2834_v50 }
0x114e   : > { %3247 = vrsqrt.f32 %v2835_v51 }
0x1158   : > { %v3248_v52 = vpop.eup %3247 }
0x1159   : > { %v2837_v53 = vmul.f32 %v3248_v52, %v2829_v46 }
0x115b   : > { %v2844_v55 = vmul.f32 %v3035_v60, %v2837_v53 }
0x115d   : > { %v2851_v56 = vadd.f32 %v3036_v54, %v2844_v55 }
0x115f   : > { %v2852_v57 = vpack.c.bf16 %v2851_v56, %v2851_v56 }
0x1161   : > { %2854 = vst.msk [vmem:[%s852_s7] sm:$0xf] %vm2853_vm12, %v2852_v57 }
0x1162 PF: > { %s35_s6 = sadd.s32 1, %s3271_s6   ;;  %s3873_s29 = smov %s3267_s2 }
0x1163   : > { %p32_p5 = scmp.ge.s32.totalorder %s35_s6, 4   ;;  %s3874_s2 = smov %s3876_s30 }
0x1165   :  { %34 = sbr.rel (!%p32_p5) target bundleno = 10 (0xa), region = 162 }

</bundles_post_ra>
